<compile_context>
chip_gen: v5e
topology: v5e:2x2
jax: 0.10.0
libtpu: 0.0.40
codegen_flags: <defaults>
</compile_context>

<pallas_src>
import jax
import jax.numpy as jnp
from jax import lax
from jax.experimental import pallas as pl
from jax.experimental.pallas import tpu as pltpu

HIDDEN = 32
NUM_HEADS = 4
HEAD_DIM = HIDDEN // NUM_HEADS
LN_EPS = 1e-5


def _enc_dec_attn_kernel(dec_ref, enc_ref, bias_ref, wqo_ref, wkv_ref, bkv_ref, vec_ref, out_ref):
    """One grid step = one batch block, with the batch folded into matmul rows.

    dec_ref : (BB*Sd, H)        decoder hidden states, f32 (residual / LN path)
    enc_ref : (BB*Se, H)        encoder hidden states, bf16 (K/V path only)
    bias_ref: (BB*Sd, BB*Se)    additive bias: (1-mask)*-1e9 on own-batch blocks, -2e9 cross-batch
    wqo_ref : (2H, H)  bf16     rows = [Wq ; Wo]
    wkv_ref : (H, 2H)  bf16     cols = [Wk | Wv]
    bkv_ref : (1, 2H)  f32      [bk | bv]
    vec_ref : (4, H)   f32      rows = bq, bo, gamma, beta
    """
    M, H = dec_ref.shape
    hd = HEAD_DIM

    dec = dec_ref[...]                                   # f32, exact residual path
    dec_bf = dec.astype(jnp.bfloat16)
    enc_bf = enc_ref[...]                                 # bf16

    wqo = wqo_ref[...]
    wq = wqo[:H, :]                                       # sublane (row) slice
    wkv = wkv_ref[...]

    vec = vec_ref[...]                                    # (4, H) f32, full-row reads only
    bq, bo, gamma, beta = vec[0:1], vec[1:2], vec[2:3], vec[3:4]
    bkv = bkv_ref[...]                                    # (1, 2H)

    # Fused projections: two big-N MXU matmuls (bf16 operands, f32 accumulation).
    q = jnp.dot(dec_bf, wq, preferred_element_type=jnp.float32) + bq       # (M, H)
    kv = jnp.dot(enc_bf, wkv, preferred_element_type=jnp.float32) + bkv    # (N, 2H)

    # Head split: lane slices stacked on a leading head axis (batch stays folded in rows).
    q_h = jnp.stack([q[:, h * hd:(h + 1) * hd] for h in range(NUM_HEADS)],
                    axis=0).astype(jnp.bfloat16)                           # (NH, M, hd)
    k_h = jnp.stack([kv[:, h * hd:(h + 1) * hd] for h in range(NUM_HEADS)],
                    axis=0).astype(jnp.bfloat16)                           # (NH, N, hd)
    v_h = jnp.stack([kv[:, H + h * hd:H + (h + 1) * hd] for h in range(NUM_HEADS)],
                    axis=0).astype(jnp.bfloat16)                           # (NH, N, hd)

    # One scores einsum, one softmax pass, one context einsum (head = the dot_general batch dim).
    scale = jnp.float32(1.0 / (hd ** 0.5))
    s = jnp.einsum('hqd,hkd->hqk', q_h, k_h,
                   preferred_element_type=jnp.float32) * scale + bias_ref[...]
    s = s - jnp.max(s, axis=-1, keepdims=True)
    p = jnp.exp(s)
    denom = jnp.sum(p, axis=-1, keepdims=True)                             # (NH, M, 1)
    ctx = jnp.einsum('hqk,hkd->hqd', p.astype(jnp.bfloat16), v_h,
                     preferred_element_type=jnp.float32)                   # (NH, M, hd)
    ctx = ctx * pl.reciprocal(denom, approx=True)        # normalize AFTER P@V (Sd*hd elements)

    # Output projection: sum_h ctx_h @ Wo_h == concat(ctx_h) @ Wo; no concat, no scratch.
    attn = jnp.zeros((M, H), jnp.float32)
    for h in range(NUM_HEADS):
        wo_h = wqo[H + h * hd:H + (h + 1) * hd, :]        # (hd, H) bf16, sublane slice
        attn = attn + jnp.dot(ctx[h].astype(jnp.bfloat16), wo_h,
                              preferred_element_type=jnp.float32)
    attn = attn + bo

    # SubLayer: LayerNorm(dec + dropout(attn)); dropout == identity at eval.
    x = dec + attn
    mean = jnp.mean(x, axis=-1, keepdims=True)
    var = jnp.mean(jnp.square(x - mean), axis=-1, keepdims=True)
    y = (x - mean) * lax.rsqrt(var + jnp.float32(LN_EPS))
    out_ref[...] = (y * gamma + beta).astype(out_ref.dtype)


def _num_parallel_blocks(batch):
    """2 grid steps on 2-TensorCore / megacore chips, else 1 (per-step overhead dominates here)."""
    try:
        kind = jax.devices()[0].device_kind.lower()
    except Exception:
        kind = ""
    two_core = any(tag in kind for tag in ("v7", "v4", "v5p"))
    if two_core and batch >= 2 and batch % 2 == 0:
        return 2
    return 1


def encoder_decoder_attention_block(dec, enc, mask, params, num_blocks=None):
    """dec: (B, Sd, H)  enc: (B, Se, H)  mask: (B, Sd, Se) with 1=attend, 0=masked -> (B, Sd, H)."""
    B, Sd, H = dec.shape
    _, Se, _ = enc.shape
    assert H == HIDDEN

    nblocks = _num_parallel_blocks(B) if num_blocks is None else num_blocks
    assert B % nblocks == 0
    BB = B // nblocks

    # ---- wrapper-side packing (layout plumbing, run once in XLA per call) ----
    dec2d = dec.reshape(B * Sd, H).astype(jnp.float32)             # f32: exact residual / LN path
    enc2d = enc.reshape(B * Se, H).astype(jnp.bfloat16)            # K/V path only -> bf16 DMA

    # Projection weights stored (in, out): kernel computes x @ W + b (== PyTorch x @ W.T + b).
    w_qo = jnp.concatenate([params["wq"], params["wo"]], axis=0).astype(jnp.bfloat16)   # (2H, H)
    w_kv = jnp.concatenate([params["wk"], params["wv"]], axis=1).astype(jnp.bfloat16)   # (H, 2H)
    b_kv = jnp.concatenate([params["bk"], params["bv"]], axis=1).astype(jnp.float32)    # (1, 2H)
    vec4 = jnp.concatenate([params["bq"], params["bo"],
                            params["gamma"], params["beta"]], axis=0).astype(jnp.float32)  # (4, H)

    # Block-diagonal additive bias: user mask (-1e9) on own-batch blocks, -2e9 cross-batch, so the
    # row-folded softmax is exactly the per-batch softmax (cross terms underflow to 0.0 in f32).
    neg = (1.0 - mask.astype(jnp.float32)) * jnp.float32(-1e9)     # (B, Sd, Se)
    neg = neg.reshape(nblocks, BB, Sd, Se)
    eye = jnp.eye(BB, dtype=jnp.float32)
    bias = (neg[:, :, :, None, :] * eye[None, :, None, :, None]
            + (eye - 1.0)[None, :, None, :, None] * jnp.float32(2e9))
    bias2d = bias.reshape(nblocks * BB * Sd, BB * Se)               # rows/cols match dec2d/enc2d

    grid_spec = pltpu.PrefetchScalarGridSpec(
        num_scalar_prefetch=0,
        grid=(nblocks,),
        in_specs=[
            pl.BlockSpec((BB * Sd, H), lambda g: (g, 0)),           # decoder rows (batch-folded)
            pl.BlockSpec((BB * Se, H), lambda g: (g, 0)),           # encoder rows (bf16)
            pl.BlockSpec((BB * Sd, BB * Se), lambda g: (g, 0)),     # block-diag additive bias
            pl.BlockSpec((2 * H, H), lambda g: (0, 0)),             # [Wq ; Wo]
            pl.BlockSpec((H, 2 * H), lambda g: (0, 0)),             # [Wk | Wv]
            pl.BlockSpec((1, 2 * H), lambda g: (0, 0)),             # [bk | bv]
            pl.BlockSpec((4, H), lambda g: (0, 0)),                 # bq, bo, gamma, beta
        ],
        out_specs=pl.BlockSpec((BB * Sd, H), lambda g: (g, 0)),
    )

    out2d = pl.pallas_call(
        _enc_dec_attn_kernel,
        out_shape=jax.ShapeDtypeStruct((B * Sd, H), jnp.float32),
        grid_spec=grid_spec,
        compiler_params=pltpu.CompilerParams(dimension_semantics=("parallel",)),
    )(dec2d, enc2d, bias2d, w_qo, w_kv, b_kv, vec4)

    return out2d.reshape(B, Sd, H).astype(dec.dtype)


def _reference(dec, enc, mask, params):
    """Plain-JAX (f32) reference for the same math."""
    q = dec @ params["wq"] + params["bq"][0]
    k = enc @ params["wk"] + params["bk"][0]
    v = enc @ params["wv"] + params["bv"][0]
    B, Sd, H = q.shape
    Se = k.shape[1]
    qh = q.reshape(B, Sd, NUM_HEADS, HEAD_DIM).transpose(0, 2, 1, 3)
    kh = k.reshape(B, Se, NUM_HEADS, HEAD_DIM).transpose(0, 2, 1, 3)
    vh = v.reshape(B, Se, NUM_HEADS, HEAD_DIM).transpose(0, 2, 1, 3)
    scores = jnp.einsum("bhqd,bhkd->bhqk", qh, kh) / (HEAD_DIM ** 0.5)
    scores = scores + (1.0 - mask)[:, None, :, :] * -1e9
    probs = jax.nn.softmax(scores, axis=-1)
    ctx = jnp.einsum("bhqk,bhkd->bhqd", probs, vh).transpose(0, 2, 1, 3).reshape(B, Sd, H)
    attn_out = ctx @ params["wo"] + params["bo"][0]
    x = dec + attn_out
    mean = jnp.mean(x, axis=-1, keepdims=True)
    var = jnp.mean(jnp.square(x - mean), axis=-1, keepdims=True)
    return (x - mean) / jnp.sqrt(var + LN_EPS) * params["gamma"][0] + params["beta"][0]


if __name__ == "__main__":
    key = jax.random.PRNGKey(0)
    B, Sd, Se, H = 8, 8, 8, HIDDEN

    keys = jax.random.split(key, 8)
    dec = jax.random.normal(keys[0], (B, Sd, H), dtype=jnp.float32)
    enc = jax.random.normal(keys[1], (B, Se, H), dtype=jnp.float32)
    # mask: 1 = attend, 0 = masked. Vary the masking across batch elements.
    mask = jnp.ones((B, Sd, Se), dtype=jnp.float32)
    mask = mask.at[1, :, Se // 2:].set(0.0)
    mask = mask.at[5, :, :Se // 4].set(0.0)

    scale = 0.1
    params = {
        "wq": scale * jax.random.normal(keys[2], (H, H), dtype=jnp.float32),
        "wk": scale * jax.random.normal(keys[3], (H, H), dtype=jnp.float32),
        "wv": scale * jax.random.normal(keys[4], (H, H), dtype=jnp.float32),
        "wo": scale * jax.random.normal(keys[5], (H, H), dtype=jnp.float32),
        "bq": jnp.zeros((1, H), jnp.float32),
        "bk": jnp.zeros((1, H), jnp.float32),
        "bv": jnp.zeros((1, H), jnp.float32),
        "bo": 0.01 * jax.random.normal(keys[6], (1, H), dtype=jnp.float32),
        "gamma": jnp.ones((1, H), jnp.float32),
        "beta": jnp.zeros((1, H), jnp.float32),
    }

    out = encoder_decoder_attention_block(dec, enc, mask, params)
    out = jax.block_until_ready(out)

    ref = _reference(dec, enc, mask, params)
    assert out.shape == (B, Sd, H)
    # Tolerance covers bf16 MXU operands (f32 accumulation) + the EUP approx reciprocal; the f32
    # residual/LayerNorm path keeps the observed error well inside 1e-2.
    assert jnp.allclose(out, ref, atol=1e-2, rtol=1e-2), "mismatch vs reference"
    print("KERNEL_OK")
</pallas_src>

<mosaic_0001>
module attributes {stable_mosaic.version = 11 : i64} {
  func.func @_enc_dec_attn_kernel(%arg0: i32, %arg1: memref<64x32xf32, #tpu.memory_space<vmem>>, %arg2: memref<64x32xbf16, #tpu.memory_space<vmem>>, %arg3: memref<64x64xf32, #tpu.memory_space<vmem>>, %arg4: memref<64x32xbf16, #tpu.memory_space<vmem>>, %arg5: memref<32x64xbf16, #tpu.memory_space<vmem>>, %arg6: memref<1x64xf32, #tpu.memory_space<vmem>>, %arg7: memref<4x32xf32, #tpu.memory_space<vmem>>, %arg8: memref<64x32xf32, #tpu.memory_space<vmem>>) attributes {dimension_semantics = [#tpu.dimension_semantics<parallel>], iteration_bounds = array<i64: 1>, scalar_prefetch = 0 : i64, scratch_operands = 0 : i64, tpu.core_type = #tpu.core_type<tc>, window_params = [{transform_indices = @transform_0, window_bounds = array<i64: 64, 32>}, {transform_indices = @transform_1, window_bounds = array<i64: 64, 32>}, {transform_indices = @transform_2, window_bounds = array<i64: 64, 64>}, {pipeline_mode = #tpu.pipeline_mode<synchronous>, transform_indices = @transform_3, window_bounds = array<i64: 64, 32>}, {pipeline_mode = #tpu.pipeline_mode<synchronous>, transform_indices = @transform_4, window_bounds = array<i64: 32, 64>}, {pipeline_mode = #tpu.pipeline_mode<synchronous>, transform_indices = @transform_5, window_bounds = array<i64: 1, 64>}, {pipeline_mode = #tpu.pipeline_mode<synchronous>, transform_indices = @transform_6, window_bounds = array<i64: 4, 32>}, {transform_indices = @transform_7, window_bounds = array<i64: 64, 32>}]} {
    %c0 = arith.constant 0 : index
    %c0_0 = arith.constant 0 : index
    %0 = vector.load %arg1[%c0, %c0_0] : memref<64x32xf32, #tpu.memory_space<vmem>>, vector<64x32xf32>
    %1 = arith.truncf %0 : vector<64x32xf32> to vector<64x32xbf16>
    %c0_1 = arith.constant 0 : index
    %c0_2 = arith.constant 0 : index
    %2 = vector.load %arg2[%c0_1, %c0_2] : memref<64x32xbf16, #tpu.memory_space<vmem>>, vector<64x32xbf16>
    %c0_3 = arith.constant 0 : index
    %c0_4 = arith.constant 0 : index
    %3 = vector.load %arg4[%c0_3, %c0_4] : memref<64x32xbf16, #tpu.memory_space<vmem>>, vector<64x32xbf16>
    %4 = vector.extract_strided_slice %3 {offsets = [0, 0], sizes = [32, 32], strides = [1, 1]} : vector<64x32xbf16> to vector<32x32xbf16>
    %c0_5 = arith.constant 0 : index
    %c0_6 = arith.constant 0 : index
    %5 = vector.load %arg5[%c0_5, %c0_6] : memref<32x64xbf16, #tpu.memory_space<vmem>>, vector<32x64xbf16>
    %c0_7 = arith.constant 0 : index
    %c0_8 = arith.constant 0 : index
    %6 = vector.load %arg7[%c0_7, %c0_8] : memref<4x32xf32, #tpu.memory_space<vmem>>, vector<4x32xf32>
    %7 = vector.extract_strided_slice %6 {offsets = [0, 0], sizes = [1, 32], strides = [1, 1]} : vector<4x32xf32> to vector<1x32xf32>
    %8 = vector.extract_strided_slice %6 {offsets = [1, 0], sizes = [1, 32], strides = [1, 1]} : vector<4x32xf32> to vector<1x32xf32>
    %9 = vector.extract_strided_slice %6 {offsets = [2, 0], sizes = [1, 32], strides = [1, 1]} : vector<4x32xf32> to vector<1x32xf32>
    %10 = vector.extract_strided_slice %6 {offsets = [3, 0], sizes = [1, 32], strides = [1, 1]} : vector<4x32xf32> to vector<1x32xf32>
    %c0_9 = arith.constant 0 : index
    %c0_10 = arith.constant 0 : index
    %11 = vector.load %arg6[%c0_9, %c0_10] : memref<1x64xf32, #tpu.memory_space<vmem>>, vector<1x64xf32>
    %cst = arith.constant dense<0.000000e+00> : vector<64x32xf32>
    %12 = tpu.matmul %1, %4, %cst {dimension_numbers = #tpu.dot_dimension_numbers<[1], [0], [0], [1], [0, 0, 1, 1], [], []>} : vector<64x32xbf16>, vector<32x32xbf16>, vector<64x32xf32> -> vector<64x32xf32>
    %13 = vector.broadcast %7 : vector<1x32xf32> to vector<64x32xf32>
    %14 = arith.addf %12, %13 : vector<64x32xf32>
    %cst_11 = arith.constant dense<0.000000e+00> : vector<64x64xf32>
    %15 = tpu.matmul %2, %5, %cst_11 {dimension_numbers = #tpu.dot_dimension_numbers<[1], [0], [0], [1], [0, 0, 1, 1], [], []>} : vector<64x32xbf16>, vector<32x64xbf16>, vector<64x64xf32> -> vector<64x64xf32>
    %16 = vector.broadcast %11 : vector<1x64xf32> to vector<64x64xf32>
    %17 = arith.addf %15, %16 : vector<64x64xf32>
    %18 = vector.extract_strided_slice %14 {offsets = [0, 0], sizes = [64, 8], strides = [1, 1]} : vector<64x32xf32> to vector<64x8xf32>
    %19 = vector.extract_strided_slice %14 {offsets = [0, 8], sizes = [64, 8], strides = [1, 1]} : vector<64x32xf32> to vector<64x8xf32>
    %20 = vector.extract_strided_slice %14 {offsets = [0, 16], sizes = [64, 8], strides = [1, 1]} : vector<64x32xf32> to vector<64x8xf32>
    %21 = vector.extract_strided_slice %14 {offsets = [0, 24], sizes = [64, 8], strides = [1, 1]} : vector<64x32xf32> to vector<64x8xf32>
    %22 = vector.shape_cast %18 : vector<64x8xf32> to vector<1x64x8xf32>
    %23 = vector.shape_cast %19 : vector<64x8xf32> to vector<1x64x8xf32>
    %24 = vector.shape_cast %20 : vector<64x8xf32> to vector<1x64x8xf32>
    %25 = vector.shape_cast %21 : vector<64x8xf32> to vector<1x64x8xf32>
    %26 = tpu.concatenate %22, %23, %24, %25 in 0 : vector<1x64x8xf32>, vector<1x64x8xf32>, vector<1x64x8xf32>, vector<1x64x8xf32> -> vector<4x64x8xf32>
    %27 = arith.truncf %26 : vector<4x64x8xf32> to vector<4x64x8xbf16>
    %28 = vector.extract_strided_slice %17 {offsets = [0, 0], sizes = [64, 8], strides = [1, 1]} : vector<64x64xf32> to vector<64x8xf32>
    %29 = vector.extract_strided_slice %17 {offsets = [0, 8], sizes = [64, 8], strides = [1, 1]} : vector<64x64xf32> to vector<64x8xf32>
    %30 = vector.extract_strided_slice %17 {offsets = [0, 16], sizes = [64, 8], strides = [1, 1]} : vector<64x64xf32> to vector<64x8xf32>
    %31 = vector.extract_strided_slice %17 {offsets = [0, 24], sizes = [64, 8], strides = [1, 1]} : vector<64x64xf32> to vector<64x8xf32>
    %32 = vector.shape_cast %28 : vector<64x8xf32> to vector<1x64x8xf32>
    %33 = vector.shape_cast %29 : vector<64x8xf32> to vector<1x64x8xf32>
    %34 = vector.shape_cast %30 : vector<64x8xf32> to vector<1x64x8xf32>
    %35 = vector.shape_cast %31 : vector<64x8xf32> to vector<1x64x8xf32>
    %36 = tpu.concatenate %32, %33, %34, %35 in 0 : vector<1x64x8xf32>, vector<1x64x8xf32>, vector<1x64x8xf32>, vector<1x64x8xf32> -> vector<4x64x8xf32>
    %37 = arith.truncf %36 : vector<4x64x8xf32> to vector<4x64x8xbf16>
    %38 = vector.extract_strided_slice %17 {offsets = [0, 32], sizes = [64, 8], strides = [1, 1]} : vector<64x64xf32> to vector<64x8xf32>
    %39 = vector.extract_strided_slice %17 {offsets = [0, 40], sizes = [64, 8], strides = [1, 1]} : vector<64x64xf32> to vector<64x8xf32>
    %40 = vector.extract_strided_slice %17 {offsets = [0, 48], sizes = [64, 8], strides = [1, 1]} : vector<64x64xf32> to vector<64x8xf32>
    %41 = vector.extract_strided_slice %17 {offsets = [0, 56], sizes = [64, 8], strides = [1, 1]} : vector<64x64xf32> to vector<64x8xf32>
    %42 = vector.shape_cast %38 : vector<64x8xf32> to vector<1x64x8xf32>
    %43 = vector.shape_cast %39 : vector<64x8xf32> to vector<1x64x8xf32>
    %44 = vector.shape_cast %40 : vector<64x8xf32> to vector<1x64x8xf32>
    %45 = vector.shape_cast %41 : vector<64x8xf32> to vector<1x64x8xf32>
    %46 = tpu.concatenate %42, %43, %44, %45 in 0 : vector<1x64x8xf32>, vector<1x64x8xf32>, vector<1x64x8xf32>, vector<1x64x8xf32> -> vector<4x64x8xf32>
    %47 = arith.truncf %46 : vector<4x64x8xf32> to vector<4x64x8xbf16>
    "tpu.trace_start"() <{level = 10 : i32, message = "hqd,hkd->hqk"}> : () -> ()
    %cst_12 = arith.constant dense<0.000000e+00> : vector<4x64x64xf32>
    %48 = tpu.matmul %27, %37, %cst_12 {dimension_numbers = #tpu.dot_dimension_numbers<[2], [2], [1], [1], [0, 0, 0, 1, 1, 1], [0], [0]>} : vector<4x64x8xbf16>, vector<4x64x8xbf16>, vector<4x64x64xf32> -> vector<4x64x64xf32>
    "tpu.trace_stop"() : () -> ()
    %cst_13 = arith.constant 0.353553385 : f32
    %49 = vector.broadcast %cst_13 : f32 to vector<4x64x64xf32>
    %50 = arith.mulf %48, %49 : vector<4x64x64xf32>
    %c0_14 = arith.constant 0 : index
    %c0_15 = arith.constant 0 : index
    %51 = vector.load %arg3[%c0_14, %c0_15] : memref<64x64xf32, #tpu.memory_space<vmem>>, vector<64x64xf32>
    %52 = vector.shape_cast %51 : vector<64x64xf32> to vector<1x64x64xf32>
    %53 = vector.broadcast %52 : vector<1x64x64xf32> to vector<4x64x64xf32>
    %54 = arith.addf %50, %53 : vector<4x64x64xf32>
    %cst_16 = arith.constant dense<0xFF800000> : vector<4x64xf32>
    %55 = vector.multi_reduction <maximumf>, %54, %cst_16 [2] : vector<4x64x64xf32> to vector<4x64xf32>
    %56 = vector.shape_cast %55 : vector<4x64xf32> to vector<4x64x1xf32>
    %57 = vector.broadcast %56 : vector<4x64x1xf32> to vector<4x64x64xf32>
    %58 = arith.subf %54, %57 : vector<4x64x64xf32>
    %59 = math.exp %58 : vector<4x64x64xf32>
    %cst_17 = arith.constant dense<0.000000e+00> : vector<4x64xf32>
    %60 = vector.multi_reduction <add>, %59, %cst_17 [2] : vector<4x64x64xf32> to vector<4x64xf32>
    %61 = vector.shape_cast %60 : vector<4x64xf32> to vector<4x64x1xf32>
    %62 = arith.truncf %59 : vector<4x64x64xf32> to vector<4x64x64xbf16>
    "tpu.trace_start"() <{level = 10 : i32, message = "hqk,hkd->hqd"}> : () -> ()
    %cst_18 = arith.constant dense<0.000000e+00> : vector<4x64x8xf32>
    %63 = tpu.matmul %62, %47, %cst_18 {dimension_numbers = #tpu.dot_dimension_numbers<[2], [1], [1], [2], [0, 0, 0, 1, 1, 2], [0], [0]>} : vector<4x64x64xbf16>, vector<4x64x8xbf16>, vector<4x64x8xf32> -> vector<4x64x8xf32>
    "tpu.trace_stop"() : () -> ()
    %64 = tpu.reciprocal %61 {approx = true} : vector<4x64x1xf32> -> vector<4x64x1xf32>
    %65 = vector.broadcast %64 : vector<4x64x1xf32> to vector<4x64x8xf32>
    %66 = arith.mulf %63, %65 : vector<4x64x8xf32>
    %cst_19 = arith.constant 0.000000e+00 : f32
    %67 = vector.broadcast %cst_19 : f32 to vector<64x32xf32>
    %68 = vector.extract_strided_slice %3 {offsets = [32, 0], sizes = [8, 32], strides = [1, 1]} : vector<64x32xbf16> to vector<8x32xbf16>
    %69 = vector.extract_strided_slice %66 {offsets = [0, 0, 0], sizes = [1, 64, 8], strides = [1, 1, 1]} : vector<4x64x8xf32> to vector<1x64x8xf32>
    %70 = vector.shape_cast %69 : vector<1x64x8xf32> to vector<64x8xf32>
    %71 = arith.truncf %70 : vector<64x8xf32> to vector<64x8xbf16>
    %cst_20 = arith.constant dense<0.000000e+00> : vector<64x32xf32>
    %72 = tpu.matmul %71, %68, %cst_20 {dimension_numbers = #tpu.dot_dimension_numbers<[1], [0], [0], [1], [0, 0, 1, 1], [], []>} : vector<64x8xbf16>, vector<8x32xbf16>, vector<64x32xf32> -> vector<64x32xf32>
    %73 = arith.addf %67, %72 : vector<64x32xf32>
    %74 = vector.extract_strided_slice %3 {offsets = [40, 0], sizes = [8, 32], strides = [1, 1]} : vector<64x32xbf16> to vector<8x32xbf16>
    %75 = vector.extract_strided_slice %66 {offsets = [1, 0, 0], sizes = [1, 64, 8], strides = [1, 1, 1]} : vector<4x64x8xf32> to vector<1x64x8xf32>
    %76 = vector.shape_cast %75 : vector<1x64x8xf32> to vector<64x8xf32>
    %77 = arith.truncf %76 : vector<64x8xf32> to vector<64x8xbf16>
    %cst_21 = arith.constant dense<0.000000e+00> : vector<64x32xf32>
    %78 = tpu.matmul %77, %74, %cst_21 {dimension_numbers = #tpu.dot_dimension_numbers<[1], [0], [0], [1], [0, 0, 1, 1], [], []>} : vector<64x8xbf16>, vector<8x32xbf16>, vector<64x32xf32> -> vector<64x32xf32>
    %79 = arith.addf %73, %78 : vector<64x32xf32>
    %80 = vector.extract_strided_slice %3 {offsets = [48, 0], sizes = [8, 32], strides = [1, 1]} : vector<64x32xbf16> to vector<8x32xbf16>
    %81 = vector.extract_strided_slice %66 {offsets = [2, 0, 0], sizes = [1, 64, 8], strides = [1, 1, 1]} : vector<4x64x8xf32> to vector<1x64x8xf32>
    %82 = vector.shape_cast %81 : vector<1x64x8xf32> to vector<64x8xf32>
    %83 = arith.truncf %82 : vector<64x8xf32> to vector<64x8xbf16>
    %cst_22 = arith.constant dense<0.000000e+00> : vector<64x32xf32>
    %84 = tpu.matmul %83, %80, %cst_22 {dimension_numbers = #tpu.dot_dimension_numbers<[1], [0], [0], [1], [0, 0, 1, 1], [], []>} : vector<64x8xbf16>, vector<8x32xbf16>, vector<64x32xf32> -> vector<64x32xf32>
    %85 = arith.addf %79, %84 : vector<64x32xf32>
    %86 = vector.extract_strided_slice %3 {offsets = [56, 0], sizes = [8, 32], strides = [1, 1]} : vector<64x32xbf16> to vector<8x32xbf16>
    %87 = vector.extract_strided_slice %66 {offsets = [3, 0, 0], sizes = [1, 64, 8], strides = [1, 1, 1]} : vector<4x64x8xf32> to vector<1x64x8xf32>
    %88 = vector.shape_cast %87 : vector<1x64x8xf32> to vector<64x8xf32>
    %89 = arith.truncf %88 : vector<64x8xf32> to vector<64x8xbf16>
    %cst_23 = arith.constant dense<0.000000e+00> : vector<64x32xf32>
    %90 = tpu.matmul %89, %86, %cst_23 {dimension_numbers = #tpu.dot_dimension_numbers<[1], [0], [0], [1], [0, 0, 1, 1], [], []>} : vector<64x8xbf16>, vector<8x32xbf16>, vector<64x32xf32> -> vector<64x32xf32>
    %91 = arith.addf %85, %90 : vector<64x32xf32>
    %92 = vector.broadcast %8 : vector<1x32xf32> to vector<64x32xf32>
    %93 = arith.addf %91, %92 : vector<64x32xf32>
    %94 = arith.addf %0, %93 : vector<64x32xf32>
    %cst_24 = arith.constant dense<0.000000e+00> : vector<64xf32>
    %95 = vector.multi_reduction <add>, %94, %cst_24 [1] : vector<64x32xf32> to vector<64xf32>
    %96 = vector.shape_cast %95 : vector<64xf32> to vector<64x1xf32>
    %cst_25 = arith.constant 3.200000e+01 : f32
    %97 = vector.broadcast %cst_25 : f32 to vector<64x1xf32>
    %98 = arith.divf %96, %97 : vector<64x1xf32>
    %99 = vector.broadcast %98 : vector<64x1xf32> to vector<64x32xf32>
    %100 = arith.subf %94, %99 : vector<64x32xf32>
    %101 = arith.mulf %100, %100 : vector<64x32xf32>
    %cst_26 = arith.constant dense<0.000000e+00> : vector<64xf32>
    %102 = vector.multi_reduction <add>, %101, %cst_26 [1] : vector<64x32xf32> to vector<64xf32>
    %103 = vector.shape_cast %102 : vector<64xf32> to vector<64x1xf32>
    %cst_27 = arith.constant 3.200000e+01 : f32
    %104 = vector.broadcast %cst_27 : f32 to vector<64x1xf32>
    %105 = arith.divf %103, %104 : vector<64x1xf32>
    %106 = vector.broadcast %98 : vector<64x1xf32> to vector<64x32xf32>
    %107 = arith.subf %94, %106 : vector<64x32xf32>
    %cst_28 = arith.constant 9.99999974E-6 : f32
    %108 = vector.broadcast %cst_28 : f32 to vector<64x1xf32>
    %109 = arith.addf %105, %108 : vector<64x1xf32>
    %110 = math.rsqrt %109 : vector<64x1xf32>
    %111 = vector.broadcast %110 : vector<64x1xf32> to vector<64x32xf32>
    %112 = arith.mulf %107, %111 : vector<64x32xf32>
    %113 = vector.broadcast %9 : vector<1x32xf32> to vector<64x32xf32>
    %114 = arith.mulf %112, %113 : vector<64x32xf32>
    %115 = vector.broadcast %10 : vector<1x32xf32> to vector<64x32xf32>
    %116 = arith.addf %114, %115 : vector<64x32xf32>
    %c0_29 = arith.constant 0 : index
    %c0_30 = arith.constant 0 : index
    %117 = vector.load %arg8[%c0_29, %c0_30] : memref<64x32xf32, #tpu.memory_space<vmem>>, vector<64x32xf32>
    tpu.vector_store %arg8[%c0_29, %c0_30], %116 {strides = array<i32>} : memref<64x32xf32, #tpu.memory_space<vmem>>, vector<64x32xf32>,
    return
  }
  func.func @transform_0(%arg0: i32) -> (i32, i32) {
    %c0_i32 = arith.constant 0 : i32
    %c0_i32_0 = arith.constant 0 : i32
    return %arg0, %c0_i32 : i32, i32
  }
  func.func @transform_1(%arg0: i32) -> (i32, i32) {
    %c0_i32 = arith.constant 0 : i32
    %c0_i32_0 = arith.constant 0 : i32
    return %arg0, %c0_i32 : i32, i32
  }
  func.func @transform_2(%arg0: i32) -> (i32, i32) {
    %c0_i32 = arith.constant 0 : i32
    %c0_i32_0 = arith.constant 0 : i32
    return %arg0, %c0_i32 : i32, i32
  }
  func.func @transform_3(%arg0: i32) -> (i32, i32) {
    %c0_i32 = arith.constant 0 : i32
    %c0_i32_0 = arith.constant 0 : i32
    %c0_i32_1 = arith.constant 0 : i32
    return %c0_i32, %c0_i32_0 : i32, i32
  }
  func.func @transform_4(%arg0: i32) -> (i32, i32) {
    %c0_i32 = arith.constant 0 : i32
    %c0_i32_0 = arith.constant 0 : i32
    %c0_i32_1 = arith.constant 0 : i32
    return %c0_i32, %c0_i32_0 : i32, i32
  }
  func.func @transform_5(%arg0: i32) -> (i32, i32) {
    %c0_i32 = arith.constant 0 : i32
    %c0_i32_0 = arith.constant 0 : i32
    %c0_i32_1 = arith.constant 0 : i32
    return %c0_i32, %c0_i32_0 : i32, i32
  }
  func.func @transform_6(%arg0: i32) -> (i32, i32) {
    %c0_i32 = arith.constant 0 : i32
    %c0_i32_0 = arith.constant 0 : i32
    %c0_i32_1 = arith.constant 0 : i32
    return %c0_i32, %c0_i32_0 : i32, i32
  }
  func.func @transform_7(%arg0: i32) -> (i32, i32) {
    %c0_i32 = arith.constant 0 : i32
    %c0_i32_0 = arith.constant 0 : i32
    return %arg0, %c0_i32 : i32, i32
  }
}

</mosaic_0001>

<bundles_post_ra>
// kernel: tpu_custom_call.1
= control target key start
LH: loop header
LB: loop body
LE: loop exit
PB: predicated region body
PF: predicated region fallthrough
CT: control target
= control target key end

     0   :  { %vm74_vm0 = vcmask 261120   ;;  %s2359_s12 = smov 104   ;;  %s2360_s13 = smov 112   ;;  %vm456_vm1 = vcmask 64512   ;;  %vm861_vm2 = vcmask 523264   ;;  %vm1558_vm3 = vcmask 1043456   ;;  %s3135_s4 = inlined_call_operand.vmem [shape: bf16[32,64], index: 4, kind: input, shape index: {}]   ;;  %s3136_s3 = inlined_call_operand.vmem [shape: bf16[64,32], index: 3, kind: input, shape index: {}]   ;;  %s3137_s0 = inlined_call_operand.vmem [shape: f32[64,32], index: 0, kind: input, shape index: {}]   ;;  %s3138_s1 = inlined_call_operand.vmem [shape: bf16[64,32], index: 1, kind: input, shape index: {}]   ;;  %s3139_s5 = inlined_call_operand.vmem [shape: f32[1,64], index: 5, kind: input, shape index: {}]   ;;  %s3140_s6 = inlined_call_operand.vmem [shape: f32[4,32], index: 6, kind: input, shape index: {}]   ;;  %s3141_s2 = inlined_call_operand.vmem [shape: f32[64,64], index: 2, kind: input, shape index: {}]   ;;  %s3142_s7 = inlined_call_operand.vmem [shape: f32[64,32], index: 7, kind: output, shape index: {}]  }
   0x1   :  { %v2072_v0 = vld [vmem:[%s3135_s4 + $0x8] sm:$0xff]  ;;  %v2071_v1 = vld [vmem:[%s3135_s4] sm:$0xff]  ;;  %v2067_v9 = vld [vmem:[%s3138_s1 + $0x10] sm:$0xff]  ;;  %s2361_s4 = smov 96  }
   0x2   :  { %169 = vmatpush.bf16.msra.mxu1 %v2072_v0  ;;  %2075 = vmatpush.bf16.msra.mxu3 %v2072_v0  ;;  %v2070_v2 = vld [vmem:[%s3136_s3 + $0x8] sm:$0xff]  ;;  %v2069_v3 = vld [vmem:[%s3136_s3] sm:$0xff]  ;;  %v29_v12 = vld [vmem:[%s3137_s0 + $0x10] sm:$0xff] }
   0x3   :  { %v27_v4 = vld [vmem:[%s3137_s0] sm:$0xff]  ;;  %93 = vmatpush.bf16.msra.mxu0 %v2070_v2  ;;  %v28_v5 = vld [vmem:[%s3137_s0 + $0x8] sm:$0xff]  ;;  %2073 = vmatpush.bf16.msra.mxu2 %v2070_v2  ;;  %v30_v13 = vld [vmem:[%s3137_s0 + $0x18] sm:$0xff] }
   0x4   :  { %v31_v6 = vld [vmem:[%s3137_s0 + $0x20] sm:$0xff]  ;;  %v32_v7 = vld [vmem:[%s3137_s0 + $0x28] sm:$0xff]  ;;  %v35_v10 = vpack.c.bf16 %v28_v5, %v27_v4  ;;  %v33_v14 = vld [vmem:[%s3137_s0 + $0x30] sm:$0xff]  ;;  %v36_v18 = vpack.c.bf16 %v30_v13, %v29_v12 }
   0x5   :  { %v2065_v8 = vld [vmem:[%s3138_s1] sm:$0xff]  ;;  %v37_v11 = vpack.c.bf16 %v32_v7, %v31_v6  ;;  %v34_v15 = vld [vmem:[%s3137_s0 + $0x38] sm:$0xff]  ;;  %v2066_v16 = vld [vmem:[%s3138_s1 + $0x8] sm:$0xff] }
   0x6   :  { %170 = vmatpush.bf16.msra.mxu1 %v2071_v1  ;;  %2076 = vmatpush.bf16.msra.mxu3 %v2071_v1  ;;  %v2068_v17 = vld [vmem:[%s3138_s1 + $0x18] sm:$0xff]  ;;  %v38_v19 = vpack.c.bf16 %v34_v15, %v33_v14  ;;  %v2202_v27 = vld [vmem:[%s3139_s5] ss:$0 sm:$0xff]  ;;  %s2358_s1 = smov 120  }
   0x7   :  { %94 = vmatpush.bf16.msra.mxu0 %v2069_v3  ;;  %2074 = vmatpush.bf16.msra.mxu2 %v2069_v3  ;;  %v59_v41 = vld [vmem:[%s3140_s6] sm:$0xf] }
   0x8   :  { %v61_v49 = vperm.slane %v59_v41, 0 }
   0x9   :  { %2013 = vmatmul.msk.bf16.vlgmr.msra.gmra.mxu1 %vm74_vm0, %v2065_v8  ;;  %2015 = vmatmul.msk.bf16.vlgmr.msra.gmra.mxu3 %vm74_vm0, %v2067_v9 }
   0xa   :  { %1985 = vmatmul.msk.bf16.vlgmr.msra.gmra.mxu0 %vm74_vm0, %v35_v10  ;;  %1987 = vmatmul.msk.bf16.vlgmr.msra.gmra.mxu2 %vm74_vm0, %v37_v11 }
  0x19   :  { %2014 = vmatmul.msk.bf16.gmra.mxu1 %vm74_vm0, %v2066_v16  ;;  %2016 = vmatmul.msk.bf16.gmra.mxu3 %vm74_vm0, %v2068_v17 }
  0x1a   :  { %1986 = vmatmul.msk.bf16.gmra.mxu0 %vm74_vm0, %v36_v18  ;;  %1988 = vmatmul.msk.bf16.gmra.mxu2 %vm74_vm0, %v38_v19 }
  0x86   :  { %v172_v20 = vpop.f32.mrf.mxu1 }
  0x87   :  { %v96_v25 = vpop.f32.mrf.mxu0  ;;  %v173_v50 = vadd.f32 %v2202_v27, %v172_v20 }
  0x88   :  { %v97_v57 = vadd.f32 %v96_v25, %v61_v49 }
  0x89   :  { %v384_v8 = vpack.c.bf16 %v173_v50, %v173_v50 }
  0x8a   :  { %v272_v14 = vpack.c.bf16 %v97_v57, %v97_v57 }
  0x8b   :  { %v444_v13 = vunpack.c.l.b16 %v384_v8 }
  0x8c   :  { %v182_v21 = vpop.f32.mrf.mxu3  ;;  %v424_v19 = vunpack.c.l.b16 %v272_v14 }
  0x8d   :  { %v183_v38 = vadd.f32 %v2202_v27, %v182_v21  ;;  %v106_v45 = vpop.f32.mrf.mxu2 }
  0x8e   :  { %v174_v22 = vpop.f32.mrf.mxu1  ;;  %v107_v17 = vadd.f32 %v106_v45, %v61_v49 }
  0x8f   :  { %v98_v34 = vpop.f32.mrf.mxu0  ;;  %v175_v46 = vadd.f32 %v2202_v27, %v174_v22  ;;  %v388_v48 = vpack.c.bf16 %v183_v38, %v183_v38 }
  0x90   :  { %v99_v58 = vadd.f32 %v98_v34, %v61_v49 }
  0x91   :  { %v2107_v55 = vpack.i.bf16 %v175_v46, %v173_v50  ;;  %v448_v56 = vunpack.c.l.b16 %v388_v48  ;;  %v385_v5 = vpack.c.bf16 %v175_v46, %v175_v46 }
  0x92   :  { %v2122_v0 = vpack.i.bf16 %v99_v58, %v97_v57  ;;  %v273_v15 = vpack.c.bf16 %v99_v58, %v99_v58 }
  0x93   :  { %v445_v10 = vunpack.c.l.b16 %v385_v5 }
  0x94   :  { %v184_v23 = vpop.f32.mrf.mxu3  ;;  %v425_v21 = vunpack.c.l.b16 %v273_v15 }
  0x95   :  { %v185_v35 = vadd.f32 %v2202_v27, %v184_v23  ;;  %v108_v62 = vpop.f32.mrf.mxu2  ;;  %v452_v16 = vpack.c.b16 %v445_v10, %v444_v13 }
  0x96   :  { %v177_v24 = vpop.f32.mrf.mxu1  ;;  %v109_v18 = vadd.f32 %v108_v62, %v61_v49 }
  0x97   :  { %v178_v29 = vadd.f32 %v2202_v27, %v177_v24  ;;  %v389_v44 = vpack.c.bf16 %v185_v35, %v185_v35  ;;  %v101_v53 = vpop.f32.mrf.mxu0  ;;  %v2087_v54 = vpack.i.bf16 %v185_v35, %v183_v38  ;;  %v470_v20 = vsel %vm456_vm1, %v452_v16, 0 }
  0x98   :  { %v102_v6 = vadd.f32 %v101_v53, %v61_v49  ;;  %v2162_v22 = vpack.i.bf16 %v109_v18, %v107_v17  ;;  %v432_v24 = vpack.c.b16 %v425_v21, %v424_v19  ;;  %v277_v34 = vpack.c.bf16 %v109_v18, %v109_v18 }
  0x99   :  { %v449_v52 = vunpack.c.l.b16 %v389_v44  ;;  %v386_v61 = vpack.c.bf16 %v178_v29, %v178_v29 }
  0x9b   :  { %v2478_v59 = vpack.c.b16 %v449_v52, %v448_v56  ;;  %v446_v2 = vunpack.c.l.b16 %v386_v61 }
  0x9c   :  { %v187_v26 = vpop.f32.mrf.mxu3 }
  0x9d   :  { %v188_v31 = vadd.f32 %v2202_v27, %v187_v26  ;;  %v476_v63 = vsel %vm456_vm1, %v2478_v59, 0  ;;  %v111_v11 = vpop.f32.mrf.mxu2 }
  0x9e   :  { %v179_v28 = vpop.f32.mrf.mxu1  ;;  %v112_v25 = vadd.f32 %v111_v11, %v61_v49 }
  0x9f   :  { %v180_v30 = vadd.f32 %v2202_v27, %v179_v28  ;;  %v390_v37 = vpack.c.bf16 %v188_v31, %v188_v31  ;;  %v103_v3 = vpop.f32.mrf.mxu0  ;;  %v274_v28 = vpack.c.bf16 %v102_v6, %v102_v6 }
  0xa0   :  { %v104_v7 = vadd.f32 %v103_v3, %v61_v49  ;;  %v278_v38 = vpack.c.bf16 %v112_v25, %v112_v25 }
  0xa1   :  { %v2462_v32 = vpack.i.bf16 %v180_v30, %v178_v29  ;;  %v450_v42 = vunpack.c.l.b16 %v390_v37  ;;  %v387_v60 = vpack.c.bf16 %v180_v30, %v180_v30  ;;  %v426_v30 = vunpack.c.l.b16 %v274_v28 }
  0xa2   :  { %v2147_v12 = vpack.i.bf16 %v104_v7, %v102_v6  ;;  %v275_v29 = vpack.c.bf16 %v104_v7, %v104_v7 }
  0xa3   :  { %2093 = vrot.lane.b32.xlu1 %v2462_v32, %s2358_s1  ;;  %v447_v1 = vunpack.c.l.b16 %v387_v60 }
  0xa4   :  { %v189_v33 = vpop.f32.mrf.mxu3 }
  0xa5   :  { %v190_v36 = vadd.f32 %v2202_v27, %v189_v33  ;;  %v453_v4 = vpack.c.b16 %v447_v1, %v446_v2  ;;  %v113_v23 = vpop.f32.mrf.mxu2  ;;  %v276_v33 = vpack.c.bf16 %v107_v17, %v107_v17 }
  0xa6   :  { %v114_v26 = vadd.f32 %v113_v23, %v61_v49 }
  0xa7   :  { %v2102_v39 = vpack.i.bf16 %v190_v36, %v188_v31  ;;  %v391_v40 = vpack.c.bf16 %v190_v36, %v190_v36  ;;  %v473_v9 = vsel %vm456_vm1, %v453_v4, 0  ;;  %v427_v31 = vunpack.c.l.b16 %v275_v29 }
  0xa8   :  { %v2177_v27 = vpack.i.bf16 %v114_v26, %v112_v25  ;;  %v428_v35 = vunpack.c.l.b16 %v276_v33  ;;  %v429_v36 = vunpack.c.l.b16 %v277_v34 }
  0xa9   :  { %2103 = vrot.lane.b32.xlu2 %v2102_v39, %s2359_s12  ;;  %2083 = vrot.lane.b32.xlu0 %v2102_v39, %s2358_s1  ;;  %v451_v43 = vunpack.c.l.b16 %v391_v40  ;;  %v430_v40 = vunpack.c.l.b16 %v278_v38 }
  0xaa   :  { %v434_v37 = vpack.c.b16 %v429_v36, %v428_v35 }
  0xab   :  { %2098 = vrot.lane.b32.xlu1 %v2102_v39, %s2360_s13  ;;  %v2472_v47 = vpack.c.b16 %v451_v43, %v450_v42  ;;  %v279_v39 = vpack.c.bf16 %v114_v26, %v114_v26 }
  0xad   :  { %v479_v51 = vsel %vm456_vm1, %v2472_v47, 0  ;;  %v431_v41 = vunpack.c.l.b16 %v279_v39 }
  0xae   :  { %485 = vmatpush.bf16.xpose.msrb.mxu2 %v479_v51 }
  0xaf   :  { %v435_v42 = vpack.c.b16 %v431_v41, %v430_v40 }
  0xb1   :  { %2088 = vrot.lane.b32.xlu0 %v2087_v54, %s2358_s1  ;;  %2108 = vrot.lane.b32.xlu2 %v2107_v55, %s2358_s1 }
  0xb3   :  { %2118 = vrot.lane.b32.xlu1 %v2087_v54, %s2359_s12 }
  0xb6   :  { %486 = vmatpush.bf16.xpose.msrb.mxu2 %v476_v63 }
  0xb9   :  { %2113 = vrot.lane.b32.xlu0 %v2087_v54, %s2360_s13  ;;  %2123 = vrot.lane.b32.xlu2 %v2122_v0, %s2358_s1 }
  0xbb   :  { %2133 = vrot.lane.b32.xlu1 %v2462_v32, %s2359_s12 }
  0xbe   :  { %487 = vmatpush.bf16.xpose.msrb.mxu2 %v473_v9 }
  0xc1   :  { %2128 = vrot.lane.b32.xlu0 %v2462_v32, %s2360_s13  ;;  %2138 = vrot.lane.b32.xlu2 %v2107_v55, %s2360_s13  ;;  %v433_v32 = vpack.c.b16 %v427_v31, %v426_v30 }
  0xc3   :  { %2148 = vrot.lane.b32.xlu1 %v2147_v12, %s2358_s1 }
  0xc6   :  { %488 = vmatpush.bf16.xpose.msrb.mxu2 %v470_v20 }
  0xc9   :  { %2143 = vrot.lane.b32.xlu0 %v2107_v55, %s2359_s12  ;;  %2153 = vrot.lane.b32.xlu2 %v2122_v0, %s2360_s13 }
  0xcb   :  { %2163 = vrot.lane.b32.xlu1 %v2162_v22, %s2358_s1 }
  0xcd   :  { %2017 = vmatmul.msk.bf16.vlgmr.msrb.gmra.mxu2 %vm456_vm1, %v432_v24 }
  0xd1   :  { %2158 = vrot.lane.b32.xlu0 %v2122_v0, %s2359_s12  ;;  %2168 = vrot.lane.b32.xlu2 %v2147_v12, %s2360_s13 }
  0xd3   :  { %2178 = vrot.lane.b32.xlu1 %v2177_v27, %s2358_s1 }
  0xd9   :  { %2173 = vrot.lane.b32.xlu0 %v2147_v12, %s2359_s12  ;;  %2183 = vrot.lane.b32.xlu2 %v2162_v22, %s2360_s13 }
  0xdb   :  { %2193 = vrot.lane.b32.xlu1 %v2177_v27, %s2360_s13 }
  0xdd   :  { %2018 = vmatmul.msk.bf16.gmra.mxu2 %vm456_vm1, %v433_v32 }
  0xe1   :  { %2188 = vrot.lane.b32.xlu0 %v2162_v22, %s2359_s12  ;;  %2198 = vrot.lane.b32.xlu2 %v2177_v27, %s2359_s12 }
  0xe3   :  { %1204 = vrot.lane.b32.xlu1 %v453_v4, %s2361_s4 }
  0xe9   :  { %1202 = vrot.lane.b32.xlu0 %v452_v16, %s2361_s4  ;;  %1206 = vrot.lane.b32.xlu2 %v2478_v59, %s2361_s4 }
  0xed   :  { %2019 = vmatmul.msk.bf16.gmra.mxu2 %vm456_vm1, %v434_v37 }
  0xf1   :  { %1208 = vrot.lane.b32.xlu0 %v2472_v47, %s2361_s4 }
  0xfd   :  { %2020 = vmatmul.msk.bf16.gmra.mxu2 %vm456_vm1, %v435_v42 }
 0x103   :  { %v2104_v43 = vpop.permute.xlu2 %2103 }
 0x104   :  { %v2106_v44 = vunpack.i.h.bf16 %v2104_v43  ;;  %v2105_v45 = vunpack.i.l.bf16 %v2104_v43 }
 0x106   :  { %v415_v46 = vpack.c.bf16 %v2106_v44, %v2106_v44  ;;  %v414_v48 = vpack.c.bf16 %v2105_v45, %v2105_v45 }
 0x108   :  { %v731_v49 = vunpack.c.l.b16 %v415_v46  ;;  %v730_v50 = vunpack.c.l.b16 %v414_v48 }
 0x10a   :  { %v2514_v51 = vpack.c.b16 %v731_v49, %v730_v50 }
 0x10b   :  { %v2109_v52 = vpop.permute.xlu2 %2108 }
 0x10c   :  { %v2111_v53 = vunpack.i.h.bf16 %v2109_v52  ;;  %v2110_v54 = vunpack.i.l.bf16 %v2109_v52  ;;  %v758_v47 = vsel %vm456_vm1, %v2514_v51, 0 }
 0x10d   :  { %764 = vmatpush.bf16.xpose.msrb.mxu1 %v758_v47 }
 0x10e   :  { %v393_v55 = vpack.c.bf16 %v2111_v53, %v2111_v53  ;;  %v392_v56 = vpack.c.bf16 %v2110_v54, %v2110_v54 }
 0x110   :  { %v539_v57 = vunpack.c.l.b16 %v393_v55  ;;  %v538_v58 = vunpack.c.l.b16 %v392_v56 }
 0x112   :  { %v2518_v59 = vpack.c.b16 %v539_v57, %v538_v58 }
 0x113   :  { %v2520_v60 = vpop.permute.xlu2 %2123 }
 0x114   :  { %1275 = vrot.lane.b32.xlu0 %v2518_v59, %s2361_s4 }
 0x115   :  { %v2094_v61 = vpop.permute.xlu1 %2093 }
 0x116   :  { %v2096_v24 = vunpack.i.h.bf16 %v2094_v61  ;;  %v2095_v25 = vunpack.i.l.bf16 %v2094_v61 }
 0x118   :  { %v395_v36 = vpack.c.bf16 %v2096_v24, %v2096_v24  ;;  %v394_v37 = vpack.c.bf16 %v2095_v25, %v2095_v25 }
 0x11a   :  { %v541_v46 = vunpack.c.l.b16 %v395_v36  ;;  %v540_v48 = vunpack.c.l.b16 %v394_v37 }
 0x11b   :  { %v2084_v62 = vpop.permute.xlu0 %2083  ;;  %v2139_v63 = vpop.permute.xlu2 %2138 }
 0x11c   :  { %v2086_v0 = vunpack.i.h.bf16 %v2084_v62  ;;  %v2085_v1 = vunpack.i.l.bf16 %v2084_v62  ;;  %v2141_v2 = vunpack.i.h.bf16 %v2139_v63  ;;  %v2140_v3 = vunpack.i.l.bf16 %v2139_v63 }
 0x11d   :  { %v2099_v4 = vpop.permute.xlu1 %2098  ;;  %v547_v63 = vpack.c.b16 %v541_v46, %v540_v48 }
 0x11e   :  { %v399_v5 = vpack.c.bf16 %v2086_v0, %v2086_v0  ;;  %v398_v6 = vpack.c.bf16 %v2085_v1, %v2085_v1  ;;  %v401_v7 = vpack.c.bf16 %v2141_v2, %v2141_v2  ;;  %v400_v8 = vpack.c.bf16 %v2140_v3, %v2140_v3 }
 0x11f   :  { %v2101_v9 = vunpack.i.h.bf16 %v2099_v4  ;;  %v2100_v10 = vunpack.i.l.bf16 %v2099_v4 }
 0x120   :  { %v545_v11 = vunpack.c.l.b16 %v399_v5  ;;  %v544_v12 = vunpack.c.l.b16 %v398_v6  ;;  %v632_v13 = vunpack.c.l.b16 %v401_v7  ;;  %v631_v14 = vunpack.c.l.b16 %v400_v8 }
 0x121   :  { %v407_v15 = vpack.c.bf16 %v2101_v9, %v2101_v9  ;;  %v406_v16 = vpack.c.bf16 %v2100_v10, %v2100_v10  ;;  %v566_v6 = vsel %vm456_vm1, %v547_v63, 0 }
 0x122   :  { %v2524_v17 = vpack.c.b16 %v632_v13, %v631_v14  ;;  %v2526_v18 = vpack.c.b16 %v545_v11, %v544_v12  ;;  %v2126_v11 = vunpack.i.h.bf16 %v2520_v60  ;;  %v2125_v12 = vunpack.i.l.bf16 %v2520_v60 }
 0x123   :  { %v638_v19 = vunpack.c.l.b16 %v407_v15  ;;  %v637_v20 = vunpack.c.l.b16 %v406_v16  ;;  %v2089_v21 = vpop.permute.xlu0 %2088  ;;  %v563_v60 = vsel %vm456_vm1, %v2518_v59, 0  ;;  %v2154_v25 = vpop.permute.xlu2 %2153 }
 0x124   :  { %v2091_v22 = vunpack.i.h.bf16 %v2089_v21  ;;  %v2090_v23 = vunpack.i.l.bf16 %v2089_v21  ;;  %1348 = vrot.lane.b32.xlu0 %v2524_v17, %s2361_s4  ;;  %v572_v26 = vsel %vm456_vm1, %v2526_v18, 0  ;;  %v656_v48 = vsel %vm456_vm1, %v2524_v17, 0 }
 0x125   :  { %v2119_v27 = vpop.permute.xlu1 %2118  ;;  %v2532_v28 = vpack.c.b16 %v638_v19, %v637_v20  ;;  %578 = vmatpush.bf16.xpose.msrb.mxu3 %v572_v26  ;;  %v281_v19 = vpack.c.bf16 %v2126_v11, %v2126_v11  ;;  %v280_v20 = vpack.c.bf16 %v2125_v12, %v2125_v12 }
 0x126   :  { %v397_v29 = vpack.c.bf16 %v2091_v22, %v2091_v22  ;;  %v396_v30 = vpack.c.bf16 %v2090_v23, %v2090_v23  ;;  %v2121_v31 = vunpack.i.h.bf16 %v2119_v27  ;;  %v2120_v32 = vunpack.i.l.bf16 %v2119_v27 }
 0x127   :  { %v665_v33 = vsel %vm456_vm1, %v2532_v28, 0 }
 0x128   :  { %v543_v34 = vunpack.c.l.b16 %v397_v29  ;;  %v542_v35 = vunpack.c.l.b16 %v396_v30  ;;  %671 = vmatpush.bf16.xpose.msrb.mxu0 %v665_v33  ;;  %v413_v38 = vpack.c.bf16 %v2121_v31, %v2121_v31  ;;  %v412_v39 = vpack.c.bf16 %v2120_v32, %v2120_v32 }
 0x129   :  { %v519_v29 = vunpack.c.l.b16 %v281_v19  ;;  %v518_v30 = vunpack.c.l.b16 %v280_v20  ;;  %v2156_v31 = vunpack.i.h.bf16 %v2154_v25  ;;  %v2155_v32 = vunpack.i.l.bf16 %v2154_v25 }
 0x12a   :  { %v548_v40 = vpack.c.b16 %v543_v34, %v542_v35  ;;  %v729_v41 = vunpack.c.l.b16 %v413_v38  ;;  %v728_v42 = vunpack.c.l.b16 %v412_v39 }
 0x12b   :  { %v2114_v43 = vpop.permute.xlu0 %2113  ;;  %v526_v36 = vpack.c.b16 %v519_v29, %v518_v30  ;;  %v289_v37 = vpack.c.bf16 %v2156_v31, %v2156_v31  ;;  %v288_v59 = vpack.c.bf16 %v2155_v32, %v2155_v32 }
 0x12c   :  { %v2116_v44 = vunpack.i.h.bf16 %v2114_v43  ;;  %v2115_v45 = vunpack.i.l.bf16 %v2114_v43  ;;  %1279 = vrot.lane.b32.xlu0 %v548_v40, %s2361_s4  ;;  %v569_v49 = vsel %vm456_vm1, %v548_v40, 0  ;;  %v734_v52 = vpack.c.b16 %v729_v41, %v728_v42 }
 0x12d   :  { %v2134_v50 = vpop.permute.xlu1 %2133  ;;  %579 = vmatpush.bf16.xpose.msrb.mxu3 %v569_v49  ;;  %v612_v49 = vunpack.c.l.b16 %v289_v37 }
 0x12e   :  { %v405_v53 = vpack.c.bf16 %v2116_v44, %v2116_v44  ;;  %v404_v54 = vpack.c.bf16 %v2115_v45, %v2115_v45  ;;  %v2136_v47 = vunpack.i.h.bf16 %v2134_v50  ;;  %v2135_v55 = vunpack.i.l.bf16 %v2134_v50 }
 0x12f   :  { %v755_v56 = vsel %vm456_vm1, %v734_v52, 0  ;;  %v611_v50 = vunpack.c.l.b16 %v288_v59 }
 0x130   :  { %v636_v57 = vunpack.c.l.b16 %v405_v53  ;;  %v635_v58 = vunpack.c.l.b16 %v404_v54  ;;  %765 = vmatpush.bf16.xpose.msrb.mxu1 %v755_v56  ;;  %v411_v61 = vpack.c.bf16 %v2136_v47, %v2136_v47  ;;  %v410_v62 = vpack.c.bf16 %v2135_v55, %v2135_v55  ;;  %v2169_v53 = vpop.permute.xlu2 %2168 }
 0x131   :  { %v2171_v17 = vunpack.i.h.bf16 %v2169_v53 }
 0x132   :  { %v641_v0 = vpack.c.b16 %v636_v57, %v635_v58  ;;  %v727_v1 = vunpack.c.l.b16 %v411_v61  ;;  %v726_v2 = vunpack.c.l.b16 %v410_v62  ;;  %v619_v57 = vpack.c.b16 %v612_v49, %v611_v50  ;;  %v2583_v49 = vld [vmem:[%s3141_s2 + $0x18] sm:$0xff] }
 0x133   :  { %v2129_v3 = vpop.permute.xlu0 %2128 }
 0x134   :  { %v2131_v4 = vunpack.i.h.bf16 %v2129_v3  ;;  %v2130_v5 = vunpack.i.l.bf16 %v2129_v3  ;;  %1352 = vrot.lane.b32.xlu2 %v641_v0, %s2361_s4  ;;  %1425 = vrot.lane.b32.xlu0 %v734_v52, %s2361_s4  ;;  %v662_v7 = vsel %vm456_vm1, %v641_v0, 0  ;;  %v733_v8 = vpack.c.b16 %v727_v1, %v726_v2 }
 0x135   :  { %580 = vmatpush.bf16.xpose.msrb.mxu3 %v566_v6  ;;  %672 = vmatpush.bf16.xpose.msrb.mxu0 %v662_v7  ;;  %v2149_v38 = vpop.permute.xlu1 %2148  ;;  %v2170_v0 = vunpack.i.l.bf16 %v2169_v53  ;;  %v291_v7 = vpack.c.bf16 %v2171_v17, %v2171_v17 }
 0x136   :  { %v403_v9 = vpack.c.bf16 %v2131_v4, %v2131_v4  ;;  %v402_v10 = vpack.c.bf16 %v2130_v5, %v2130_v5  ;;  %v752_v13 = vsel %vm456_vm1, %v733_v8, 0  ;;  %v2151_v43 = vunpack.i.h.bf16 %v2149_v38 }
 0x137   :  { %v2150_v44 = vunpack.i.l.bf16 %v2149_v38 }
 0x138   :  { %v634_v14 = vunpack.c.l.b16 %v403_v9  ;;  %v633_v15 = vunpack.c.l.b16 %v402_v10  ;;  %766 = vmatpush.bf16.xpose.msrb.mxu1 %v752_v13  ;;  %v283_v54 = vpack.c.bf16 %v2151_v43, %v2151_v43  ;;  %v2184_v5 = vpop.permute.xlu2 %2183  ;;  %v614_v13 = vunpack.c.l.b16 %v291_v7 }
 0x139   :  { %v282_v47 = vpack.c.bf16 %v2150_v44, %v2150_v44  ;;  %v2185_v29 = vunpack.i.l.bf16 %v2184_v5  ;;  %v2578_v44 = vld [vmem:[%s3141_s2] sm:$0xff] }
 0x13a   :  { %v640_v16 = vpack.c.b16 %v634_v14, %v633_v15 }
 0x13b   :  { %v2144_v21 = vpop.permute.xlu0 %2143  ;;  %v520_v58 = vunpack.c.l.b16 %v282_v47  ;;  %v292_v38 = vpack.c.bf16 %v2185_v29, %v2185_v29 }
 0x13c   :  { %v2146_v22 = vunpack.i.h.bf16 %v2144_v21  ;;  %v2145_v23 = vunpack.i.l.bf16 %v2144_v21  ;;  %1350 = vrot.lane.b32.xlu1 %v640_v16, %s2361_s4  ;;  %1423 = vrot.lane.b32.xlu2 %v733_v8, %s2361_s4  ;;  %v659_v24 = vsel %vm456_vm1, %v640_v16, 0  ;;  %v290_v8 = vpack.c.bf16 %v2170_v0, %v2170_v0  ;;  %v2600_v0 = vld [vmem:[%s3141_s2 + $0x8] sm:$0xff] }
 0x13d   :  { %1277 = vrot.lane.b32.xlu0 %v547_v63, %s2361_s4  ;;  %581 = vmatpush.bf16.xpose.msrb.mxu3 %v563_v60  ;;  %v2164_v61 = vpop.permute.xlu1 %2163 }
 0x13e   :  { %v409_v26 = vpack.c.bf16 %v2146_v22, %v2146_v22  ;;  %v408_v27 = vpack.c.bf16 %v2145_v23, %v2145_v23  ;;  %673 = vmatpush.bf16.xpose.msrb.mxu0 %v659_v24  ;;  %v2165_v9 = vunpack.i.l.bf16 %v2164_v61  ;;  %v613_v14 = vunpack.c.l.b16 %v290_v8 }
 0x140   :  { %v725_v33 = vunpack.c.l.b16 %v409_v26  ;;  %v724_v34 = vunpack.c.l.b16 %v408_v27  ;;  %v284_v19 = vpack.c.bf16 %v2165_v9, %v2165_v9  ;;  %v620_v22 = vpack.c.b16 %v614_v13, %v613_v14  ;;  %v2568_v23 = vpop.permute.xlu2 %2198 }
 0x141   :  { %v2186_v27 = vunpack.i.h.bf16 %v2184_v5 }
 0x142   :  { %v2552_v35 = vpack.c.b16 %v725_v33, %v724_v34  ;;  %v522_v24 = vunpack.c.l.b16 %v284_v19 }
 0x143   :  { %v2159_v39 = vpop.permute.xlu0 %2158  ;;  %v293_v37 = vpack.c.bf16 %v2186_v27, %v2186_v27 }
 0x144   :  { %v2161_v40 = vunpack.i.h.bf16 %v2159_v39  ;;  %v2160_v41 = vunpack.i.l.bf16 %v2159_v39  ;;  %1281 = vrot.lane.b32.xlu1 %v2526_v18, %s2361_s4  ;;  %v749_v42 = vsel %vm456_vm1, %v2552_v35, 0  ;;  %2021 = vmatmul.msk.bf16.vlgmr.msrb.gmra.mxu3 %vm456_vm1, %v526_v36 }
 0x145   :  { %1427 = vrot.lane.b32.xlu0 %v2514_v51, %s2361_s4  ;;  %767 = vmatpush.bf16.xpose.msrb.mxu1 %v749_v42  ;;  %v521_v51 = vunpack.c.l.b16 %v283_v54  ;;  %v2179_v12 = vpop.permute.xlu1 %2178 }
 0x146   :  { %v297_v45 = vpack.c.bf16 %v2161_v40, %v2161_v40  ;;  %v296_v46 = vpack.c.bf16 %v2160_v41, %v2160_v41  ;;  %674 = vmatpush.bf16.xpose.msrb.mxu0 %v656_v48  ;;  %v2181_v39 = vunpack.i.h.bf16 %v2179_v12  ;;  %v2180_v59 = vunpack.i.l.bf16 %v2179_v12 }
 0x147   :  { %v527_v4 = vpack.c.b16 %v521_v51, %v520_v58 }
 0x148   :  { %v705_v18 = vunpack.c.l.b16 %v297_v45  ;;  %v704_v52 = vunpack.c.l.b16 %v296_v46  ;;  %v1207_v43 = vpop.permute.xlu2 %1206  ;;  %v616_v45 = vunpack.c.l.b16 %v293_v37  ;;  %v615_v46 = vunpack.c.l.b16 %v292_v38 }
 0x149   :  { %v287_v50 = vpack.c.bf16 %v2181_v39, %v2181_v39 }
 0x14a   :  { %v712_v55 = vpack.c.b16 %v705_v18, %v704_v52  ;;  %v286_v18 = vpack.c.bf16 %v2180_v59, %v2180_v59 }
 0x14b   :  { %v2174_v56 = vpop.permute.xlu0 %2173 }
 0x14c   :  { %1354 = vrot.lane.b32.xlu1 %v2532_v28, %s2361_s4  ;;  %v2176_v62 = vunpack.i.h.bf16 %v2174_v56  ;;  %v2175_v63 = vunpack.i.l.bf16 %v2174_v56  ;;  %2029 = vmatmul.msk.bf16.vlgmr.msrb.gmra.mxu1 %vm456_vm1, %v712_v55  ;;  %v2166_v28 = vunpack.i.h.bf16 %v2164_v61  ;;  %v621_v56 = vpack.c.b16 %v616_v45, %v615_v46 }
 0x14d   :  { %2025 = vmatmul.msk.bf16.vlgmr.msrb.gmra.mxu0 %vm456_vm1, %v619_v57  ;;  %v2194_v31 = vpop.permute.xlu1 %2193  ;;  %v525_v57 = vunpack.c.l.b16 %v287_v50  ;;  %v524_v51 = vunpack.c.l.b16 %v286_v18 }
 0x14e   :  { %v299_v2 = vpack.c.bf16 %v2176_v62, %v2176_v62  ;;  %v298_v3 = vpack.c.bf16 %v2175_v63, %v2175_v63  ;;  %v285_v16 = vpack.c.bf16 %v2166_v28, %v2166_v28  ;;  %v2196_v62 = vunpack.i.h.bf16 %v2194_v31 }
 0x14f   :  { %v2195_v63 = vunpack.i.l.bf16 %v2194_v31 }
 0x150   :  { %v490_v1 = vpop.f32.mrf.mxu2  ;;  %v707_v10 = vunpack.c.l.b16 %v299_v2  ;;  %v706_v11 = vunpack.c.l.b16 %v298_v3  ;;  %v523_v60 = vunpack.c.l.b16 %v285_v16  ;;  %v2200_v2 = vunpack.i.l.bf16 %v2568_v23 }
 0x151   :  { %v789_v42 = vmul.f32 0.35355338, %v490_v1  ;;  %v2201_v1 = vunpack.i.h.bf16 %v2568_v23  ;;  %v294_v7 = vpack.c.bf16 %v2195_v63, %v2195_v63 }
 0x152   :  { %v713_v20 = vpack.c.b16 %v707_v10, %v706_v11  ;;  %v528_v34 = vpack.c.b16 %v523_v60, %v522_v24  ;;  %v302_v28 = vpack.c.bf16 %v2200_v2, %v2200_v2 }
 0x153   :  { %v2189_v6 = vpop.permute.xlu0 %2188  ;;  %v2586_v54 = vadd.f32 %v2578_v44, %v789_v42  ;;  %v303_v8 = vpack.c.bf16 %v2201_v1, %v2201_v1  ;;  %v617_v11 = vunpack.c.l.b16 %v294_v7 }
 0x154   :  { %2022 = vmatmul.msk.bf16.gmra.mxu3 %vm456_vm1, %v527_v4  ;;  %v2191_v25 = vunpack.i.h.bf16 %v2189_v6  ;;  %v2190_v26 = vunpack.i.l.bf16 %v2189_v6  ;;  %v529_v4 = vpack.c.b16 %v525_v57, %v524_v51  ;;  %v295_v6 = vpack.c.bf16 %v2196_v62, %v2196_v62 }
 0x155   :  { %v1205_v47 = vpop.permute.xlu1 %1204  ;;  %v862_v17 = vsel %vm861_vm2, %v2586_v54, -inf  ;;  %v711_v12 = vunpack.c.l.b16 %v303_v8  ;;  %v710_v13 = vunpack.c.l.b16 %v302_v28 }
 0x156   :  { %v301_v32 = vpack.c.bf16 %v2191_v25, %v2191_v25  ;;  %v300_v33 = vpack.c.bf16 %v2190_v26, %v2190_v26  ;;  %v618_v10 = vunpack.c.l.b16 %v295_v6  ;;  %v2628_v26 = vld [vmem:[%s3141_s2 + $0x10] sm:$0xff] }
 0x158   :  { %v492_v15 = vpop.f32.mrf.mxu2  ;;  %v709_v40 = vunpack.c.l.b16 %v301_v32  ;;  %v708_v41 = vunpack.c.l.b16 %v300_v33  ;;  %v622_v19 = vpack.c.b16 %v618_v10, %v617_v11 }
 0x159   :  { %v790_v58 = vmul.f32 0.35355338, %v492_v15  ;;  %v2613_v15 = vld [vmem:[%s3141_s2 + $0x28] sm:$0xff] }
 0x15a   :  { %v714_v53 = vpack.c.b16 %v709_v40, %v708_v41 }
 0x15b   :  { %v1203_v21 = vpop.permute.xlu0 %1202  ;;  %v2605_v5 = vadd.f32 %v2600_v0, %v790_v58 }
 0x15c   :  { %2030 = vmatmul.msk.bf16.gmra.mxu1 %vm456_vm1, %v713_v20  ;;  %v715_v20 = vpack.c.b16 %v711_v12, %v710_v13 }
 0x15d   :  { %2026 = vmatmul.msk.bf16.gmra.mxu0 %vm456_vm1, %v620_v22  ;;  %v865_v9 = vsel %vm861_vm2, %v2605_v5, -inf }
 0x160   :  { %v2572_v30 = vpop.f32.mrf.mxu2 }
 0x161   :  { %v791_v25 = vmul.f32 0.35355338, %v2572_v30 }
 0x163   :  { %v1209_v36 = vpop.permute.xlu0 %1208  ;;  %v2631_v29 = vadd.f32 %v2628_v26, %v791_v25 }
 0x164   :  { %1230 = vmatpush.bf16.msra.mxu2 %v1209_v36  ;;  %2023 = vmatmul.msk.bf16.gmra.mxu3 %vm456_vm1, %v528_v34 }
 0x165   :  { %v868_v32 = vsel %vm861_vm2, %v2631_v29, -inf }
 0x168   :  { %v497_v48 = vpop.f32.mrf.mxu2  ;;  %1231 = vmatpush.bf16.msra.mxu2 %v1207_v43 }
 0x169   :  { %v792_v52 = vmul.f32 0.35355338, %v497_v48 }
 0x16b   :  { %v2589_v55 = vadd.f32 %v2583_v49, %v792_v52 }
 0x16c   :  { %1232 = vmatpush.bf16.msra.mxu2 %v1205_v47  ;;  %2031 = vmatmul.msk.bf16.gmra.mxu1 %vm456_vm1, %v714_v53 }
 0x16d   :  { %v871_v61 = vsel %vm861_vm2, %v2589_v55, -inf  ;;  %2027 = vmatmul.msk.bf16.gmra.mxu0 %vm456_vm1, %v621_v56 }
 0x16e   :  { %872 = vmax.xlane.f32.xlu2 %v871_v61 }
 0x16f   :  { %863 = vmax.xlane.f32.xlu0 %v862_v17 }
 0x170   :  { %v500_v3 = vpop.f32.mrf.mxu2  ;;  %1233 = vmatpush.bf16.msra.mxu2 %v1203_v21 }
 0x171   :  { %v793_v31 = vmul.f32 0.35355338, %v500_v3 }
 0x174   :  { %2024 = vmatmul.msk.bf16.gmra.mxu3 %vm456_vm1, %v529_v4 }
 0x176   :  { %866 = vmax.xlane.f32.xlu1 %v865_v9 }
 0x178   :  { %v502_v14 = vpop.f32.mrf.mxu2 }
 0x179   :  { %v794_v16 = vmul.f32 0.35355338, %v502_v14 }
 0x17b   :  { %v2616_v21 = vadd.f32 %v2613_v15, %v794_v16 }
 0x17c   :  { %2032 = vmatmul.msk.bf16.gmra.mxu1 %vm456_vm1, %v715_v20 }
 0x17d   :  { %v877_v22 = vsel %vm861_vm2, %v2616_v21, -inf  ;;  %2028 = vmatmul.msk.bf16.gmra.mxu0 %vm456_vm1, %v622_v19 }
 0x17e   :  { %878 = vmax.xlane.f32.xlu1 %v877_v22 }
 0x183   :  { %1421 = vrot.lane.b32.xlu0 %v2552_v35, %s2361_s4  ;;  %v2638_v35 = vld [vmem:[%s3141_s2 + $0x20] sm:$0xff] }
 0x184   :  { %v2641_v34 = vadd.f32 %v2638_v35, %v793_v31 }
 0x186   :  { %v1276_v23 = vpop.permute.xlu0 %1275  ;;  %v874_v36 = vsel %vm861_vm2, %v2641_v34, -inf }
 0x18e   :  { %v1353_v37 = vpop.permute.xlu2 %1352 }
 0x196   :  { %v1349_v60 = vpop.permute.xlu0 %1348  ;;  %v1424_v40 = vpop.permute.xlu2 %1423 }
 0x19e   :  { %v1280_v24 = vpop.permute.xlu0 %1279 }
 0x1a6   :  { %v1426_v27 = vpop.permute.xlu0 %1425 }
 0x1ad   :  { %869 = vmax.xlane.f32.xlu0 %v868_v32 }
 0x1ae   :  { %v1351_v30 = vpop.permute.xlu1 %1350 }
 0x1af   :  { %v1278_v33 = vpop.permute.xlu0 %1277 }
 0x1b5   :  { %875 = vmax.xlane.f32.xlu0 %v874_v36 }
 0x1b6   :  { %v1282_v38 = vpop.permute.xlu1 %1281 }
 0x1b7   :  { %v1428_v39 = vpop.permute.xlu0 %1427  ;;  %1303 = vmatpush.bf16.msra.mxu3 %v1282_v38 }
 0x1b8   :  { %1449 = vmatpush.bf16.msra.mxu1 %v1428_v39 }
 0x1bb   :  { %1304 = vmatpush.bf16.msra.mxu3 %v1280_v24 }
 0x1bc   :  { %1450 = vmatpush.bf16.msra.mxu1 %v1426_v27 }
 0x1be   :  { %v1355_v59 = vpop.permute.xlu1 %1354 }
 0x1bf   :  { %1305 = vmatpush.bf16.msra.mxu3 %v1278_v33  ;;  %1376 = vmatpush.bf16.msra.mxu0 %v1355_v59 }
 0x1c0   :  { %1451 = vmatpush.bf16.msra.mxu1 %v1424_v40 }
 0x1c3   :  { %1306 = vmatpush.bf16.msra.mxu3 %v1276_v23  ;;  %1377 = vmatpush.bf16.msra.mxu0 %v1353_v37  ;;  %v505_v23 = vpop.f32.mrf.mxu2 }
 0x1c4   :  { %v795_v25 = vmul.f32 0.35355338, %v505_v23 }
 0x1c7   :  { %1378 = vmatpush.bf16.msra.mxu0 %v1351_v30  ;;  %v583_v41 = vpop.f32.mrf.mxu3 }
 0x1c8   :  { %v797_v52 = vmul.f32 0.35355338, %v583_v41 }
 0x1c9   :  { %v769_v42 = vpop.f32.mrf.mxu1 }
 0x1ca   :  { %v676_v43 = vpop.f32.mrf.mxu0  ;;  %v813_v45 = vmul.f32 0.35355338, %v769_v42  ;;  %v2656_v58 = vadd.f32 %v2578_v44, %v797_v52 }
 0x1cb   :  { %1379 = vmatpush.bf16.msra.mxu0 %v1349_v60  ;;  %v805_v46 = vmul.f32 0.35355338, %v676_v43 }
 0x1cc   :  { %v2646_v48 = vadd.f32 %v2578_v44, %v813_v45  ;;  %v886_v17 = vsel %vm861_vm2, %v2656_v58, -inf }
 0x1cd   :  { %v2649_v50 = vadd.f32 %v2578_v44, %v805_v46 }
 0x1ce   :  { %v934_v18 = vsel %vm861_vm2, %v2646_v48, -inf }
 0x1cf   :  { %v585_v53 = vpop.f32.mrf.mxu3  ;;  %v910_v47 = vsel %vm861_vm2, %v2649_v50, -inf  ;;  %935 = vmax.xlane.f32.xlu1 %v934_v18 }
 0x1d0   :  { %911 = vmax.xlane.f32.xlu2 %v910_v47  ;;  %v798_v8 = vmul.f32 0.35355338, %v585_v53 }
 0x1d1   :  { %v771_v56 = vpop.f32.mrf.mxu1 }
 0x1d2   :  { %v678_v57 = vpop.f32.mrf.mxu0  ;;  %v814_v62 = vmul.f32 0.35355338, %v771_v56  ;;  %v2680_v20 = vadd.f32 %v2600_v0, %v798_v8 }
 0x1d3   :  { %v806_v51 = vmul.f32 0.35355338, %v678_v57 }
 0x1d4   :  { %v2666_v6 = vadd.f32 %v2600_v0, %v814_v62 }
 0x1d5   :  { %v2659_v61 = vadd.f32 %v2600_v0, %v806_v51  ;;  %v2694_v0 = vld [vmem:[%s3141_s2 + $0x30] sm:$0xff]  ;;  %v507_v51 = vpop.f32.mrf.mxu2 }
 0x1d6   :  { %v937_v9 = vsel %vm861_vm2, %v2666_v6, -inf  ;;  %v2698_v37 = vadd.f32 %v2694_v0, %v795_v25 }
 0x1d7   :  { %v588_v63 = vpop.f32.mrf.mxu3  ;;  %v913_v1 = vsel %vm861_vm2, %v2659_v61, -inf }
 0x1d8   :  { %887 = vmax.xlane.f32.xlu2 %v886_v17  ;;  %914 = vmax.xlane.f32.xlu1 %v913_v1  ;;  %v799_v44 = vmul.f32 0.35355338, %v588_v63  ;;  %v880_v42 = vsel %vm861_vm2, %v2698_v37, -inf }
 0x1d9   :  { %v774_v2 = vpop.f32.mrf.mxu1 }
 0x1da   :  { %v681_v3 = vpop.f32.mrf.mxu0  ;;  %v2676_v13 = vadd.f32 %v2628_v26, %v799_v44  ;;  %v815_v31 = vmul.f32 0.35355338, %v774_v2 }
 0x1db   :  { %v807_v4 = vmul.f32 0.35355338, %v681_v3 }
 0x1dc   :  { %v892_v24 = vsel %vm861_vm2, %v2676_v13, -inf  ;;  %v2701_v40 = vadd.f32 %v2628_v26, %v815_v31 }
 0x1dd   :  { %v2669_v7 = vadd.f32 %v2628_v26, %v807_v4  ;;  %v796_v4 = vmul.f32 0.35355338, %v507_v51 }
 0x1de   :  { %v940_v46 = vsel %vm861_vm2, %v2701_v40, -inf }
 0x1df   :  { %v590_v28 = vpop.f32.mrf.mxu3  ;;  %v916_v10 = vsel %vm861_vm2, %v2669_v7, -inf }
 0x1e0   :  { %938 = vmax.xlane.f32.xlu2 %v937_v9  ;;  %917 = vmax.xlane.f32.xlu1 %v916_v10  ;;  %v800_v44 = vmul.f32 0.35355338, %v590_v28 }
 0x1e1   :  { %v776_v11 = vpop.f32.mrf.mxu1 }
 0x1e2   :  { %v864_v12 = vpop.xlane.xlu0 %863  ;;  %v683_v14 = vpop.f32.mrf.mxu0  ;;  %v816_v16 = vmul.f32 0.35355338, %v776_v11  ;;  %v828_v11 = vld [vmem:[%s3141_s2 + $0x38] sm:$0xff] }
 0x1e3   :  { %v958_v19 = vsub.f32 %v2586_v54, %v864_v12  ;;  %v889_v54 = vsel %vm861_vm2, %v2680_v20, -inf }
 0x1e4   :  { %v2683_v22 = vadd.f32 %v2583_v49, %v816_v16  ;;  %v2737_v16 = vadd.f32 %v828_v11, %v796_v4 }
 0x1e5   :  { %v990_v60 = vmul.f32 1.442695, %v958_v19 }
 0x1e6   :  { %v943_v27 = vsel %vm861_vm2, %v2683_v22, -inf  ;;  %v883_v25 = vsel %vm861_vm2, %v2737_v16, -inf }
 0x1e7   :  { %v593_v32 = vpop.f32.mrf.mxu3  ;;  %944 = vmax.xlane.f32.xlu0 %v943_v27  ;;  %2203 = vpow2.f32 %v990_v60 }
 0x1e8   :  { %890 = vmax.xlane.f32.xlu2 %v889_v54  ;;  %893 = vmax.xlane.f32.xlu1 %v892_v24  ;;  %v801_v28 = vmul.f32 0.35355338, %v593_v32 }
 0x1e9   :  { %v867_v30 = vpop.xlane.xlu1 %866  ;;  %v779_v39 = vpop.f32.mrf.mxu1 }
 0x1ea   :  { %v959_v33 = vsub.f32 %v2605_v5, %v867_v30  ;;  %v686_v36 = vpop.f32.mrf.mxu0  ;;  %v808_v5 = vmul.f32 0.35355338, %v683_v14  ;;  %v2735_v14 = vadd.f32 %v2583_v49, %v800_v44  ;;  %v817_v19 = vmul.f32 0.35355338, %v779_v39 }
 0x1eb   :  { %v809_v38 = vmul.f32 0.35355338, %v686_v36 }
 0x1ec   :  { %v992_v59 = vmul.f32 1.442695, %v959_v33  ;;  %v2722_v57 = vadd.f32 %v2583_v49, %v808_v5  ;;  %v895_v24 = vsel %vm861_vm2, %v2735_v14, -inf  ;;  %v2746_v49 = vadd.f32 %v2638_v35, %v801_v28  ;;  %v873_v5 = vpop.xlane.xlu2 %872 }
 0x1ed   :  { %v2704_v41 = vadd.f32 %v2638_v35, %v809_v38  ;;  %v2708_v43 = vpop.eup %2203  ;;  %v2749_v54 = vadd.f32 %v2638_v35, %v817_v19 }
 0x1ee   :  { %2205 = vpow2.f32 %v992_v59  ;;  %v1150_v52 = vpack.c.bf16 %v2708_v43, %v2708_v43  ;;  %v919_v9 = vsel %vm861_vm2, %v2722_v57, -inf  ;;  %v898_v39 = vsel %vm861_vm2, %v2746_v49, -inf }
 0x1ef   :  { %v595_v45 = vpop.f32.mrf.mxu3  ;;  %v922_v18 = vsel %vm861_vm2, %v2704_v41, -inf  ;;  %881 = vmax.xlane.f32.xlu0 %v880_v42  ;;  %v946_v59 = vsel %vm861_vm2, %v2749_v54, -inf  ;;  %v1054_v44 = vsel %vm861_vm2, %v2708_v43, 0.0 }
 0x1f0   :  { %v802_v26 = vmul.f32 0.35355338, %v595_v45  ;;  %941 = vmax.xlane.f32.xlu2 %v940_v46  ;;  %923 = vmax.xlane.f32.xlu1 %v922_v18  ;;  %v1190_v2 = vunpack.c.l.b16 %v1150_v52  ;;  %v961_v52 = vsub.f32 %v2589_v55, %v873_v5 }
 0x1f1   :  { %v781_v17 = vpop.f32.mrf.mxu1 }
 0x1f2   :  { %v688_v53 = vpop.f32.mrf.mxu0  ;;  %v2717_v47 = vadd.f32 %v2613_v15, %v802_v26  ;;  %v818_v55 = vmul.f32 0.35355338, %v781_v17 }
 0x1f3   :  { %v810_v36 = vmul.f32 0.35355338, %v688_v53 }
 0x1f4   :  { %v2719_v56 = vpop.eup %2205  ;;  %v901_v1 = vsel %vm861_vm2, %v2717_v47, -inf }
 0x1f5   :  { %v1151_v62 = vpack.c.bf16 %v2719_v56, %v2719_v56  ;;  %v1422_v63 = vpop.permute.xlu0 %1421  ;;  %v2761_v45 = vadd.f32 %v2613_v15, %v810_v36 }
 0x1f6   :  { %1452 = vmatpush.bf16.msra.mxu1 %v1422_v63 }
 0x1f7   :  { %v1191_v3 = vunpack.c.l.b16 %v1151_v62  ;;  %v598_v8 = vpop.f32.mrf.mxu3  ;;  %v925_v51 = vsel %vm861_vm2, %v2761_v45, -inf }
 0x1f8   :  { %920 = vmax.xlane.f32.xlu2 %v919_v9  ;;  %902 = vmax.xlane.f32.xlu1 %v901_v1  ;;  %v803_v53 = vmul.f32 0.35355338, %v598_v8  ;;  %v996_v1 = vmul.f32 1.442695, %v961_v52  ;;  %v2784_v8 = vadd.f32 %v2613_v15, %v818_v55 }
 0x1f9   :  { %v1198_v10 = vpack.c.b16 %v1191_v3, %v1190_v2  ;;  %v784_v23 = vpop.f32.mrf.mxu1 }
 0x1fa   :  { %v691_v12 = vpop.f32.mrf.mxu0  ;;  %v2775_v2 = vadd.f32 %v2694_v0, %v803_v53  ;;  %2207 = vpow2.f32 %v996_v1 }
 0x1fb   :  { %2033 = vmatmul.msk.bf16.vlgmr.msra.gmra.mxu2 %vm861_vm2, %v1198_v10  ;;  %v811_v32 = vmul.f32 0.35355338, %v691_v12  ;;  %v819_v10 = vmul.f32 0.35355338, %v784_v23  ;;  %v949_v12 = vsel %vm861_vm2, %v2784_v8, -inf }
 0x1fc   :  { %v904_v4 = vsel %vm861_vm2, %v2775_v2, -inf }
 0x1fd   :  { %v2758_v42 = vadd.f32 %v2694_v0, %v811_v32  ;;  %v2791_v43 = vadd.f32 %v2694_v0, %v819_v10 }
 0x1ff   :  { %v600_v60 = vpop.f32.mrf.mxu3  ;;  %v928_v26 = vsel %vm861_vm2, %v2758_v42, -inf  ;;  %v952_v15 = vsel %vm861_vm2, %v2791_v43, -inf }
 0x200   :  { %v804_v27 = vmul.f32 0.35355338, %v600_v60  ;;  %896 = vmax.xlane.f32.xlu2 %v895_v24  ;;  %884 = vmax.xlane.f32.xlu1 %v883_v25  ;;  %v2208_v9 = vpop.eup %2207  ;;  %v879_v60 = vpop.xlane.xlu1 %878 }
 0x201   :  { %v786_v35 = vpop.f32.mrf.mxu1  ;;  %v1063_v28 = vsel %vm861_vm2, %v2208_v9, 0.0  ;;  %v963_v24 = vsub.f32 %v2616_v21, %v879_v60 }
 0x202   :  { %v2743_v31 = vadd.f32 %v828_v11, %v804_v27  ;;  %v693_v30 = vpop.f32.mrf.mxu0  ;;  %v820_v18 = vmul.f32 0.35355338, %v786_v35  ;;  %v1153_v27 = vpack.c.bf16 %v2208_v9, %v2208_v9 }
 0x203   :  { %v812_v38 = vmul.f32 0.35355338, %v693_v30  ;;  %v1000_v36 = vmul.f32 1.442695, %v963_v24 }
 0x204   :  { %v907_v33 = vsel %vm861_vm2, %v2743_v31, -inf  ;;  %v2772_v63 = vadd.f32 %v828_v11, %v820_v18 }
 0x205   :  { %908 = vmax.xlane.f32.xlu0 %v907_v33  ;;  %v2763_v46 = vadd.f32 %v828_v11, %v812_v38  ;;  %v1193_v38 = vunpack.c.l.b16 %v1153_v27 }
 0x206   :  { %v955_v3 = vsel %vm861_vm2, %v2772_v63, -inf }
 0x207   :  { %v931_v62 = vsel %vm861_vm2, %v2763_v46, -inf }
 0x208   :  { %899 = vmax.xlane.f32.xlu2 %v898_v39  ;;  %947 = vmax.xlane.f32.xlu1 %v946_v59  ;;  %v1057_v39 = vsel %vm861_vm2, %v2719_v56, 0.0 }
 0x20d   :  { %929 = vmax.xlane.f32.xlu0 %v928_v26 }
 0x210   :  { %926 = vmax.xlane.f32.xlu2 %v925_v51  ;;  %932 = vmax.xlane.f32.xlu1 %v931_v62 }
 0x215   :  { %956 = vmax.xlane.f32.xlu0 %v955_v3 }
 0x218   :  { %905 = vmax.xlane.f32.xlu2 %v904_v4  ;;  %1055 = vadd.xlane.f32.xlu1 %v1054_v44 }
 0x220   :  { %v870_v11 = vpop.xlane.xlu0 %869  ;;  %950 = vmax.xlane.f32.xlu2 %v949_v12  ;;  %1064 = vadd.xlane.f32.xlu1 %v1063_v28 }
 0x221   :  { %v960_v17 = vsub.f32 %v2631_v29, %v870_v11 }
 0x223   :  { %v994_v19 = vmul.f32 1.442695, %v960_v17 }
 0x225   :  { %2209 = vpow2.f32 %v994_v19 }
 0x228   :  { %v876_v23 = vpop.xlane.xlu0 %875  ;;  %953 = vmax.xlane.f32.xlu2 %v952_v15 }
 0x229   :  { %v962_v25 = vsub.f32 %v2641_v34, %v876_v23 }
 0x22b   :  { %v2210_v32 = vpop.eup %2209  ;;  %v998_v29 = vmul.f32 1.442695, %v962_v25 }
 0x22c   :  { %v1060_v30 = vsel %vm861_vm2, %v2210_v32, 0.0  ;;  %v1152_v33 = vpack.c.bf16 %v2210_v32, %v2210_v32 }
 0x22d   :  { %1061 = vadd.xlane.f32.xlu0 %v1060_v30  ;;  %2211 = vpow2.f32 %v998_v29 }
 0x22e   :  { %v1192_v0 = vunpack.c.l.b16 %v1152_v33  ;;  %2213 = vpow2.f32 %v1000_v36 }
 0x230   :  { %v1199_v59 = vpack.c.b16 %v1193_v38, %v1192_v0  ;;  %1058 = vadd.xlane.f32.xlu2 %v1057_v39 }
 0x232   :  { %2034 = vmatmul.msk.bf16.gmra.mxu2 %vm861_vm2, %v1199_v59 }
 0x233   :  { %v2212_v21 = vpop.eup %2211 }
 0x234   :  { %v2801_v34 = vpop.eup %2213  ;;  %v1066_v35 = vsel %vm861_vm2, %v2212_v21, 0.0  ;;  %v1154_v5 = vpack.c.bf16 %v2212_v21, %v2212_v21 }
 0x235   :  { %v1155_v18 = vpack.c.bf16 %v2801_v34, %v2801_v34 }
 0x236   :  { %v1194_v26 = vunpack.c.l.b16 %v1154_v5 }
 0x237   :  { %v1195_v52 = vunpack.c.l.b16 %v1155_v18 }
 0x238   :  { %1067 = vadd.xlane.f32.xlu2 %v1066_v35 }
 0x239   :  { %v1200_v53 = vpack.c.b16 %v1195_v52, %v1194_v26 }
 0x242   :  { %2035 = vmatmul.msk.bf16.gmra.mxu2 %vm861_vm2, %v1200_v53  ;;  %v936_v56 = vpop.xlane.xlu1 %935 }
 0x243   :  { %v912_v51 = vpop.xlane.xlu2 %911  ;;  %v982_v62 = vsub.f32 %v2646_v48, %v936_v56 }
 0x244   :  { %v974_v1 = vsub.f32 %v2649_v50, %v912_v51 }
 0x245   :  { %v1038_v3 = vmul.f32 1.442695, %v982_v62 }
 0x246   :  { %v1022_v55 = vmul.f32 1.442695, %v974_v1 }
 0x247   :  { %2215 = vpow2.f32 %v1038_v3 }
 0x248   :  { %2217 = vpow2.f32 %v1022_v55 }
 0x24b   :  { %v888_v4 = vpop.xlane.xlu2 %887  ;;  %v915_v44 = vpop.xlane.xlu1 %914 }
 0x24c   :  { %v966_v9 = vsub.f32 %v2656_v58, %v888_v4  ;;  %v975_v10 = vsub.f32 %v2659_v61, %v915_v44 }
 0x24d   :  { %v2216_v11 = vpop.eup %2215 }
 0x24e   :  { %v2218_v12 = vpop.eup %2217  ;;  %v1006_v28 = vmul.f32 1.442695, %v966_v9  ;;  %v1024_v17 = vmul.f32 1.442695, %v975_v10  ;;  %v1126_v19 = vsel %vm861_vm2, %v2216_v11, 0.0  ;;  %v1174_v59 = vpack.c.bf16 %v2216_v11, %v2216_v11 }
 0x24f   :  { %v1102_v48 = vsel %vm861_vm2, %v2218_v12, 0.0  ;;  %1127 = vadd.xlane.f32.xlu1 %v1126_v19  ;;  %v1166_v58 = vpack.c.bf16 %v2218_v12, %v2218_v12 }
 0x250   :  { %2219 = vpow2.f32 %v1006_v28  ;;  %1103 = vadd.xlane.f32.xlu2 %v1102_v48 }
 0x251   :  { %2221 = vpow2.f32 %v1024_v17  ;;  %v1336_v32 = vunpack.c.l.b16 %v1166_v58 }
 0x253   :  { %v939_v50 = vpop.xlane.xlu2 %938  ;;  %v918_v60 = vpop.xlane.xlu1 %917 }
 0x254   :  { %v983_v15 = vsub.f32 %v2666_v6, %v939_v50  ;;  %v976_v35 = vsub.f32 %v2669_v7, %v918_v60 }
 0x256   :  { %v2220_v23 = vpop.eup %2219  ;;  %v1040_v24 = vmul.f32 1.442695, %v983_v15 }
 0x257   :  { %v2222_v61 = vpop.eup %2221  ;;  %v1078_v25 = vsel %vm861_vm2, %v2220_v23, 0.0  ;;  %v1158_v3 = vpack.c.bf16 %v2220_v23, %v2220_v23 }
 0x258   :  { %v1167_v27 = vpack.c.bf16 %v2222_v61, %v2222_v61  ;;  %2223 = vpow2.f32 %v1040_v24  ;;  %1079 = vadd.xlane.f32.xlu0 %v1078_v25  ;;  %v1105_v53 = vsel %vm861_vm2, %v2222_v61, 0.0 }
 0x259   :  { %v1263_v12 = vunpack.c.l.b16 %v1158_v3 }
 0x25a   :  { %v1337_v29 = vunpack.c.l.b16 %v1167_v27  ;;  %v945_v30 = vpop.xlane.xlu0 %944 }
 0x25b   :  { %v891_v33 = vpop.xlane.xlu2 %890  ;;  %v894_v36 = vpop.xlane.xlu1 %893  ;;  %v985_v39 = vsub.f32 %v2683_v22, %v945_v30 }
 0x25c   :  { %v1344_v0 = vpack.c.b16 %v1337_v29, %v1336_v32  ;;  %v967_v38 = vsub.f32 %v2680_v20, %v891_v33  ;;  %v968_v6 = vsub.f32 %v2676_v13, %v894_v36  ;;  %v1409_v20 = vunpack.c.l.b16 %v1174_v59 }
 0x25d   :  { %v1044_v56 = vmul.f32 1.442695, %v985_v39  ;;  %v1026_v13 = vmul.f32 1.442695, %v976_v35 }
 0x25e   :  { %v2224_v21 = vpop.eup %2223  ;;  %v1008_v5 = vmul.f32 1.442695, %v967_v38  ;;  %v1010_v18 = vmul.f32 1.442695, %v968_v6  ;;  %2041 = vmatmul.msk.bf16.vlgmr.msra.gmra.mxu0 %vm861_vm2, %v1344_v0 }
 0x25f   :  { %v1175_v26 = vpack.c.bf16 %v2224_v21, %v2224_v21  ;;  %v1129_v52 = vsel %vm861_vm2, %v2224_v21, 0.0 }
 0x260   :  { %2225 = vpow2.f32 %v1008_v5  ;;  %1130 = vadd.xlane.f32.xlu2 %v1129_v52  ;;  %1106 = vadd.xlane.f32.xlu0 %v1105_v53 }
 0x261   :  { %v1410_v22 = vunpack.c.l.b16 %v1175_v26  ;;  %2227 = vpow2.f32 %v1010_v18 }
 0x262   :  { %2229 = vpow2.f32 %v1044_v56  ;;  %v882_v17 = vpop.xlane.xlu0 %881 }
 0x263   :  { %v1417_v51 = vpack.c.b16 %v1410_v22, %v1409_v20  ;;  %v942_v62 = vpop.xlane.xlu2 %941  ;;  %v2822_v7 = vpop.xlane.xlu1 %923  ;;  %2231 = vpow2.f32 %v1026_v13  ;;  %v964_v23 = vsub.f32 %v2698_v37, %v882_v17 }
 0x264   :  { %v984_v1 = vsub.f32 %v2701_v40, %v942_v62  ;;  %v978_v56 = vsub.f32 %v2704_v41, %v2822_v7 }
 0x265   :  { %2045 = vmatmul.msk.bf16.vlgmr.msra.gmra.mxu1 %vm861_vm2, %v1417_v51  ;;  %v1002_v30 = vmul.f32 1.442695, %v964_v23 }
 0x266   :  { %v2226_v55 = vpop.eup %2225  ;;  %v1042_v4 = vmul.f32 1.442695, %v984_v1 }
 0x267   :  { %v2826_v44 = vpop.eup %2227  ;;  %v1159_v9 = vpack.c.bf16 %v2226_v55, %v2226_v55  ;;  %v1081_v10 = vsel %vm861_vm2, %v2226_v55, 0.0 }
 0x268   :  { %2233 = vpow2.f32 %v1042_v4  ;;  %v1084_v11 = vsel %vm861_vm2, %v2826_v44, 0.0  ;;  %1082 = vadd.xlane.f32.xlu1 %v1081_v10  ;;  %v2230_v40 = vpop.eup %2229  ;;  %v1160_v3 = vpack.c.bf16 %v2826_v44, %v2826_v44  ;;  %v1030_v10 = vmul.f32 1.442695, %v978_v56 }
 0x269   :  { %v1264_v28 = vunpack.c.l.b16 %v1159_v9  ;;  %1085 = vadd.xlane.f32.xlu2 %v1084_v11  ;;  %v2232_v60 = vpop.eup %2231  ;;  %v1177_v58 = vpack.c.bf16 %v2230_v40, %v2230_v40  ;;  %v1135_v18 = vsel %vm861_vm2, %v2230_v40, 0.0 }
 0x26a   :  { %v1108_v32 = vsel %vm861_vm2, %v2232_v60, 0.0  ;;  %v1265_v44 = vunpack.c.l.b16 %v1160_v3 }
 0x26b   :  { %v1271_v19 = vpack.c.b16 %v1264_v28, %v1263_v12  ;;  %v921_v48 = vpop.xlane.xlu2 %920  ;;  %v903_v50 = vpop.xlane.xlu1 %902 }
 0x26c   :  { %v977_v15 = vsub.f32 %v2722_v57, %v921_v48  ;;  %v971_v25 = vsub.f32 %v2717_v47, %v903_v50  ;;  %v1412_v57 = vunpack.c.l.b16 %v1177_v58  ;;  %v1168_v47 = vpack.c.bf16 %v2232_v60, %v2232_v60 }
 0x26d   :  { %2037 = vmatmul.msk.bf16.vlgmr.msra.gmra.mxu3 %vm861_vm2, %v1271_v19 }
 0x26e   :  { %v2234_v24 = vpop.eup %2233  ;;  %v1028_v61 = vmul.f32 1.442695, %v977_v15  ;;  %v1016_v36 = vmul.f32 1.442695, %v971_v25 }
 0x26f   :  { %v1132_v27 = vsel %vm861_vm2, %v2234_v24, 0.0  ;;  %v1176_v29 = vpack.c.bf16 %v2234_v24, %v2234_v24 }
 0x270   :  { %2235 = vpow2.f32 %v1028_v61  ;;  %1133 = vadd.xlane.f32.xlu0 %v1132_v27  ;;  %1109 = vadd.xlane.f32.xlu1 %v1108_v32  ;;  %v1069_v27 = vsel %vm861_vm2, %v2801_v34, 0.0 }
 0x271   :  { %v1411_v33 = vunpack.c.l.b16 %v1176_v29  ;;  %2237 = vpow2.f32 %v1002_v30 }
 0x272   :  { %2239 = vpow2.f32 %v1016_v36 }
 0x273   :  { %v897_v37 = vpop.xlane.xlu2 %896  ;;  %v885_v0 = vpop.xlane.xlu1 %884  ;;  %v1418_v38 = vpack.c.b16 %v1412_v57, %v1411_v33 }
 0x274   :  { %v969_v39 = vsub.f32 %v2735_v14, %v897_v37  ;;  %v965_v6 = vsub.f32 %v2737_v16, %v885_v0  ;;  %v1338_v14 = vunpack.c.l.b16 %v1168_v47 }
 0x275   :  { %2046 = vmatmul.msk.bf16.gmra.mxu1 %vm861_vm2, %v1418_v38 }
 0x276   :  { %v2236_v59 = vpop.eup %2235  ;;  %v1012_v21 = vmul.f32 1.442695, %v969_v39  ;;  %v1004_v35 = vmul.f32 1.442695, %v965_v6 }
 0x277   :  { %v1111_v5 = vsel %vm861_vm2, %v2236_v59, 0.0  ;;  %v1169_v26 = vpack.c.bf16 %v2236_v59, %v2236_v59  ;;  %v2844_v53 = vpop.eup %2237 }
 0x278   :  { %2241 = vpow2.f32 %v1012_v21  ;;  %1112 = vadd.xlane.f32.xlu2 %v1111_v5  ;;  %1136 = vadd.xlane.f32.xlu1 %v1135_v18  ;;  %v2842_v52 = vpop.xlane.xlu0 %908  ;;  %v2848_v51 = vpop.eup %2239  ;;  %v1156_v41 = vpack.c.bf16 %v2844_v53, %v2844_v53  ;;  %v1072_v3 = vsel %vm861_vm2, %v2844_v53, 0.0 }
 0x279   :  { %2243 = vpow2.f32 %v1004_v35  ;;  %v1339_v16 = vunpack.c.l.b16 %v1169_v26  ;;  %v1093_v11 = vsel %vm861_vm2, %v2848_v51, 0.0  ;;  %v973_v36 = vsub.f32 %v2743_v31, %v2842_v52  ;;  %v51_v26 = vld [vmem:[%s3136_s3 + $0x10] sm:$0xf] }
 0x27a   :  { %v1196_v17 = vunpack.c.l.b16 %v1156_v41  ;;  %v1163_v39 = vpack.c.bf16 %v2848_v51, %v2848_v51 }
 0x27b   :  { %v900_v20 = vpop.xlane.xlu2 %899  ;;  %v948_v22 = vpop.xlane.xlu1 %947  ;;  %v1345_v13 = vpack.c.b16 %v1339_v16, %v1338_v14  ;;  %v1020_v31 = vmul.f32 1.442695, %v973_v36 }
 0x27c   :  { %v970_v62 = vsub.f32 %v2746_v49, %v900_v20  ;;  %v986_v1 = vsub.f32 %v2749_v54, %v948_v22  ;;  %v1268_v52 = vunpack.c.l.b16 %v1163_v39 }
 0x27d   :  { %2042 = vmatmul.msk.bf16.gmra.mxu0 %vm861_vm2, %v1345_v13 }
 0x27e   :  { %v2242_v55 = vpop.eup %2241  ;;  %v1014_v4 = vmul.f32 1.442695, %v970_v62  ;;  %v1046_v9 = vmul.f32 1.442695, %v986_v1 }
 0x27f   :  { %v2244_v7 = vpop.eup %2243  ;;  %v1087_v49 = vsel %vm861_vm2, %v2242_v55, 0.0  ;;  %v1161_v12 = vpack.c.bf16 %v2242_v55, %v2242_v55 }
 0x280   :  { %2245 = vpow2.f32 %v1014_v4  ;;  %1094 = vadd.xlane.f32.xlu2 %v1093_v11  ;;  %1088 = vadd.xlane.f32.xlu0 %v1087_v49  ;;  %v1157_v54 = vpack.c.bf16 %v2244_v7, %v2244_v7  ;;  %v930_v40 = vpop.xlane.xlu0 %929 }
 0x281   :  { %2247 = vpow2.f32 %v1046_v9  ;;  %v1266_v28 = vunpack.c.l.b16 %v1161_v12  ;;  %v980_v58 = vsub.f32 %v2758_v42, %v930_v40 }
 0x282   :  { %v1197_v19 = vunpack.c.l.b16 %v1157_v54  ;;  %2249 = vpow2.f32 %v1030_v10 }
 0x283   :  { %v927_v48 = vpop.xlane.xlu2 %926  ;;  %v1272_v50 = vpack.c.b16 %v1266_v28, %v1265_v44  ;;  %v933_v61 = vpop.xlane.xlu1 %932  ;;  %v1034_v30 = vmul.f32 1.442695, %v980_v58 }
 0x284   :  { %v979_v60 = vsub.f32 %v2761_v45, %v927_v48  ;;  %v1201_v15 = vpack.c.b16 %v1197_v19, %v1196_v17  ;;  %v981_v42 = vsub.f32 %v2763_v46, %v933_v61  ;;  %v1235_v58 = vpop.f32.mrf.mxu2 }
 0x285   :  { %2038 = vmatmul.msk.bf16.gmra.mxu3 %vm861_vm2, %v1272_v50 }
 0x286   :  { %v2246_v23 = vpop.eup %2245  ;;  %v1032_v24 = vmul.f32 1.442695, %v979_v60  ;;  %2036 = vmatmul.msk.bf16.gmra.mxu2 %vm861_vm2, %v1201_v15  ;;  %v1036_v38 = vmul.f32 1.442695, %v981_v42 }
 0x287   :  { %v2864_v25 = vpop.eup %2247  ;;  %v1090_v32 = vsel %vm861_vm2, %v2246_v23, 0.0  ;;  %v1162_v57 = vpack.c.bf16 %v2246_v23, %v2246_v23 }
 0x288   :  { %2251 = vpow2.f32 %v1032_v24  ;;  %1070 = vadd.xlane.f32.xlu0 %v1069_v27  ;;  %1091 = vadd.xlane.f32.xlu1 %v1090_v32  ;;  %v1138_v45 = vsel %vm861_vm2, %v2864_v25, 0.0  ;;  %v2250_v29 = vpop.eup %2249  ;;  %v957_v37 = vpop.xlane.xlu0 %956  ;;  %v1178_v53 = vpack.c.bf16 %v2864_v25, %v2864_v25 }
 0x289   :  { %1139 = vadd.xlane.f32.xlu2 %v1138_v45  ;;  %v1170_v0 = vpack.c.bf16 %v2250_v29, %v2250_v29  ;;  %2253 = vpow2.f32 %v1034_v30  ;;  %v1114_v46 = vsel %vm861_vm2, %v2250_v29, 0.0  ;;  %v989_v59 = vsub.f32 %v2772_v63, %v957_v37  ;;  %v52_v45 = vld [vmem:[%s3136_s3 + $0x14] sm:$0xf] }
 0x28a   :  { %v1267_v35 = vunpack.c.l.b16 %v1162_v57  ;;  %2255 = vpow2.f32 %v1036_v38  ;;  %v1604_v63 = vsel %vm1558_vm3, %v51_v26, 0  ;;  %v1413_v15 = vunpack.c.l.b16 %v1178_v53 }
 0x28b   :  { %v906_v33 = vpop.xlane.xlu2 %905  ;;  %v1340_v18 = vunpack.c.l.b16 %v1170_v0  ;;  %1613 = vmatpush.bf16.msrb.mxu3 %v1604_v63  ;;  %v1052_v16 = vmul.f32 1.442695, %v989_v59  ;;  %v1056_v32 = vpop.xlane.xlu1 %1055  ;;  %v1560_v42 = vsel %vm1558_vm3, %v52_v45, 0  ;;  %v54_v0 = vld [vmem:[%s3136_s3 + $0x1c] sm:$0xf] }
 0x28c   :  { %v972_v34 = vsub.f32 %v2775_v2, %v906_v33  ;;  %v1075_v2 = vsel %vm861_vm2, %v2244_v7, 0.0  ;;  %v1273_v20 = vpack.c.b16 %v1268_v52, %v1267_v35  ;;  %1569 = vmatpush.bf16.msrb.mxu2 %v1560_v42  ;;  %v1237_v36 = vpop.f32.mrf.mxu2  ;;  %v1708_v39 = vsel %vm1558_vm3, %v54_v0, 0 }
 0x28d   :  { %1717 = vmatpush.bf16.msrb.mxu1 %v1708_v39 }
 0x28e   :  { %v2252_v6 = vpop.eup %2251  ;;  %v1018_v47 = vmul.f32 1.442695, %v972_v34  ;;  %v53_v34 = vld [vmem:[%s3136_s3 + $0x18] sm:$0xf] }
 0x28f   :  { %v1117_v21 = vsel %vm861_vm2, %v2252_v6, 0.0  ;;  %v1171_v5 = vpack.c.bf16 %v2252_v6, %v2252_v6  ;;  %v2254_v13 = vpop.eup %2253  ;;  %v1652_v38 = vsel %vm1558_vm3, %v53_v34, 0 }
 0x290   :  { %1115 = vadd.xlane.f32.xlu0 %v1114_v46  ;;  %1118 = vadd.xlane.f32.xlu1 %v1117_v21  ;;  %2257 = vpow2.f32 %v1018_v47  ;;  %v2888_v1 = vpop.eup %2255  ;;  %v1120_v4 = vsel %vm861_vm2, %v2254_v13, 0.0  ;;  %v1172_v12 = vpack.c.bf16 %v2254_v13, %v2254_v13 }
 0x291   :  { %1076 = vadd.xlane.f32.xlu2 %v1075_v2  ;;  %v1341_v14 = vunpack.c.l.b16 %v1171_v5  ;;  %2259 = vpow2.f32 %v1020_v31  ;;  %v1173_v7 = vpack.c.bf16 %v2888_v1, %v2888_v1  ;;  %1661 = vmatpush.bf16.msrb.mxu0 %v1652_v38  ;;  %v1123_v59 = vsel %vm861_vm2, %v2888_v1, 0.0 }
 0x292   :  { %2261 = vpow2.f32 %v1052_v16  ;;  %v1342_v60 = vunpack.c.l.b16 %v1172_v12 }
 0x293   :  { %v951_v56 = vpop.xlane.xlu2 %950  ;;  %v1346_v22 = vpack.c.b16 %v1341_v14, %v1340_v18  ;;  %v1343_v19 = vunpack.c.l.b16 %v1173_v7  ;;  %v1065_v26 = vpop.xlane.xlu1 %1064 }
 0x294   :  { %v987_v51 = vsub.f32 %v2784_v8, %v951_v56 }
 0x295   :  { %2039 = vmatmul.msk.bf16.gmra.mxu3 %vm861_vm2, %v1273_v20  ;;  %2043 = vmatmul.msk.bf16.gmra.mxu0 %vm861_vm2, %v1346_v22  ;;  %v1347_v25 = vpack.c.b16 %v1343_v19, %v1342_v60 }
 0x296   :  { %v1048_v62 = vmul.f32 1.442695, %v987_v51  ;;  %v2258_v55 = vpop.eup %2257 }
 0x297   :  { %v2260_v9 = vpop.eup %2259  ;;  %v1164_v8 = vpack.c.bf16 %v2258_v55, %v2258_v55  ;;  %v1096_v30 = vsel %vm861_vm2, %v2258_v55, 0.0 }
 0x298   :  { %2263 = vpow2.f32 %v1048_v62  ;;  %1073 = vadd.xlane.f32.xlu1 %v1072_v3  ;;  %v2262_v11 = vpop.eup %2261  ;;  %v1165_v49 = vpack.c.bf16 %v2260_v9, %v2260_v9  ;;  %v1099_v28 = vsel %vm861_vm2, %v2260_v9, 0.0 }
 0x299   :  { %1121 = vadd.xlane.f32.xlu2 %v1120_v4  ;;  %v1269_v17 = vunpack.c.l.b16 %v1164_v8  ;;  %v1181_v47 = vpack.c.bf16 %v2262_v11, %v2262_v11 }
 0x29a   :  { %v1270_v50 = vunpack.c.l.b16 %v1165_v49 }
 0x29b   :  { %v954_v41 = vpop.xlane.xlu2 %953  ;;  %v1416_v5 = vunpack.c.l.b16 %v1181_v47 }
 0x29c   :  { %v988_v10 = vsub.f32 %v2791_v43, %v954_v41  ;;  %v1147_v43 = vsel %vm861_vm2, %v2262_v11, 0.0  ;;  %v1274_v61 = vpack.c.b16 %v1270_v50, %v1269_v17 }
 0x29e   :  { %v2264_v54 = vpop.eup %2263  ;;  %v1050_v44 = vmul.f32 1.442695, %v988_v10 }
 0x29f   :  { %v1141_v40 = vsel %vm861_vm2, %v2264_v54, 0.0  ;;  %v1179_v48 = vpack.c.bf16 %v2264_v54, %v2264_v54 }
 0x2a0   :  { %2265 = vpow2.f32 %v1050_v44  ;;  %1142 = vadd.xlane.f32.xlu0 %v1141_v40  ;;  %1100 = vadd.xlane.f32.xlu1 %v1099_v28  ;;  %v1062_v52 = vpop.xlane.xlu0 %1061 }
 0x2a1   :  { %1148 = vadd.xlane.f32.xlu2 %v1147_v43  ;;  %v1414_v23 = vunpack.c.l.b16 %v1179_v48 }
 0x2a3   :  { %v1059_v24 = vpop.xlane.xlu2 %1058  ;;  %v1419_v27 = vpack.c.b16 %v1414_v23, %v1413_v15 }
 0x2a4   :  { %2267 = vrcp.f32 %v1059_v24 }
 0x2a5   :  { %2040 = vmatmul.msk.bf16.gmra.mxu3 %vm861_vm2, %v1274_v61  ;;  %2044 = vmatmul.msk.bf16.gmra.mxu0 %vm861_vm2, %v1347_v25  ;;  %2269 = vrcp.f32 %v1056_v32 }
 0x2a6   :  { %v2266_v29 = vpop.eup %2265  ;;  %2047 = vmatmul.msk.bf16.gmra.mxu1 %vm861_vm2, %v1419_v27  ;;  %2271 = vrcp.f32 %v1065_v26 }
 0x2a7   :  { %v1144_v33 = vsel %vm861_vm2, %v2266_v29, 0.0  ;;  %v1180_v37 = vpack.c.bf16 %v2266_v29, %v2266_v29  ;;  %2273 = vrcp.f32 %v1062_v52 }
 0x2a8   :  { %1097 = vadd.xlane.f32.xlu0 %v1096_v30  ;;  %1145 = vadd.xlane.f32.xlu1 %v1144_v33 }
 0x2a9   :  { %v1415_v21 = vunpack.c.l.b16 %v1180_v37 }
 0x2aa   :  { %v2268_v57 = vpop.eup %2267 }
 0x2ab   :  { %v2270_v6 = vpop.eup %2269  ;;  %v1507_v46 = vmul.f32 %v2268_v57, %v1237_v36  ;;  %v1420_v18 = vpack.c.b16 %v1416_v5, %v1415_v21  ;;  %v1068_v13 = vpop.xlane.xlu2 %1067 }
 0x2ac   :  { %v1506_v35 = vmul.f32 %v2270_v6, %v1235_v58  ;;  %v2272_v63 = vpop.eup %2271 }
 0x2ad   :  { %v2274_v56 = vpop.eup %2273 }
 0x2ae   :  { %v1538_v31 = vpack.c.bf16 %v1507_v46, %v1506_v35 }
 0x2b0   :  { %1124 = vadd.xlane.f32.xlu0 %v1123_v59 }
 0x2b5   :  { %v1240_v2 = vpop.f32.mrf.mxu2  ;;  %2053 = vmatmul.msk.bf16.vlgmr.msrb.gmra.mxu3 %vm456_vm1, %v1538_v31 }
 0x2b6   :  { %2048 = vmatmul.msk.bf16.gmra.mxu1 %vm861_vm2, %v1420_v18  ;;  %v1508_v20 = vmul.f32 %v2274_v56, %v1240_v2 }
 0x2bd   :  { %v1242_v14 = vpop.f32.mrf.mxu2 }
 0x2be   :  { %v1509_v16 = vmul.f32 %v2272_v63, %v1242_v14 }
 0x2c0   :  { %v1539_v22 = vpack.c.bf16 %v1509_v16, %v1508_v20 }
 0x2c2   :  { %v1128_v1 = vpop.xlane.xlu1 %1127 }
 0x2c3   :  { %v1104_v62 = vpop.xlane.xlu2 %1103 }
 0x2c4   :  { %2275 = vrcp.f32 %v1104_v62 }
 0x2c5   :  { %2054 = vmatmul.msk.bf16.gmra.mxu3 %vm456_vm1, %v1539_v22  ;;  %v1245_v25 = vpop.f32.mrf.mxu2 }
 0x2ca   :  { %v2276_v41 = vpop.eup %2275 }
 0x2cb   :  { %v1080_v51 = vpop.xlane.xlu0 %1079 }
 0x2cd   :  { %v1247_v21 = vpop.f32.mrf.mxu2 }
 0x2d3   :  { %v1131_v3 = vpop.xlane.xlu2 %1130  ;;  %v1107_v55 = vpop.xlane.xlu0 %1106 }
 0x2d4   :  { %2277 = vrcp.f32 %v1107_v55 }
 0x2d5   :  { %2279 = vrcp.f32 %v1128_v1 }
 0x2d6   :  { %2281 = vrcp.f32 %v1131_v3 }
 0x2d7   :  { %2283 = vrcp.f32 %v1080_v51 }
 0x2da   :  { %v2278_v7 = vpop.eup %2277 }
 0x2db   :  { %v1381_v4 = vpop.f32.mrf.mxu0  ;;  %v1083_v9 = vpop.xlane.xlu1 %1082 }
 0x2dc   :  { %v2923_v10 = vpop.xlane.xlu2 %1085  ;;  %v1522_v49 = vmul.f32 %v2276_v41, %v1381_v4  ;;  %v2280_v44 = vpop.eup %2279  ;;  %2285 = vrcp.f32 %v1083_v9 }
 0x2dd   :  { %v2282_v28 = vpop.eup %2281 }
 0x2de   :  { %v2284_v61 = vpop.eup %2283 }
 0x2e2   :  { %v1454_v8 = vpop.f32.mrf.mxu1  ;;  %v2286_v27 = vpop.eup %2285 }
 0x2e3   :  { %v1383_v11 = vpop.f32.mrf.mxu0  ;;  %v1110_v54 = vpop.xlane.xlu1 %1109  ;;  %v1530_v17 = vmul.f32 %v2280_v44, %v1454_v8 }
 0x2e4   :  { %v1523_v12 = vmul.f32 %v2278_v7, %v1383_v11  ;;  %v1134_v19 = vpop.xlane.xlu0 %1133 }
 0x2e5   :  { %2287 = vrcp.f32 %v1134_v19 }
 0x2e6   :  { %v1635_v53 = vpack.c.bf16 %v1523_v12, %v1522_v49 }
 0x2e8   :  { %2057 = vmatmul.msk.bf16.vlgmr.msrb.gmra.mxu0 %vm456_vm1, %v1635_v53 }
 0x2ea   :  { %v1456_v40 = vpop.f32.mrf.mxu1 }
 0x2eb   :  { %v1531_v48 = vmul.f32 %v2282_v28, %v1456_v40  ;;  %v1113_v43 = vpop.xlane.xlu2 %1112  ;;  %v1137_v15 = vpop.xlane.xlu1 %1136 }
 0x2ec   :  { %2289 = vrcp.f32 %v1137_v15  ;;  %v2288_v45 = vpop.eup %2287 }
 0x2ed   :  { %v1691_v50 = vpack.c.bf16 %v1531_v48, %v1530_v17  ;;  %2291 = vrcp.f32 %v1068_v13 }
 0x2ee   :  { %2293 = vrcp.f32 %v1110_v54 }
 0x2ef   :  { %2061 = vmatmul.msk.bf16.vlgmr.msrb.gmra.mxu1 %vm456_vm1, %v1691_v50  ;;  %2295 = vrcp.f32 %v1113_v43 }
 0x2f0   :  { %v1308_v60 = vpop.f32.mrf.mxu3 }
 0x2f1   :  { %v1514_v29 = vmul.f32 %v2284_v61, %v1308_v60 }
 0x2f2   :  { %v1459_v23 = vpop.f32.mrf.mxu1  ;;  %v2290_v30 = vpop.eup %2289 }
 0x2f3   :  { %v1089_v58 = vpop.xlane.xlu0 %1088  ;;  %v2927_v24 = vpop.xlane.xlu2 %1094  ;;  %v1532_v36 = vmul.f32 %v2288_v45, %v1459_v23 }
 0x2f4   :  { %v2292_v47 = vpop.eup %2291 }
 0x2f5   :  { %v2294_v46 = vpop.eup %2293  ;;  %v1510_v31 = vmul.f32 %v2292_v47, %v1245_v25 }
 0x2f6   :  { %v2296_v59 = vpop.eup %2295 }
 0x2f8   :  { %v1310_v32 = vpop.f32.mrf.mxu3 }
 0x2f9   :  { %v1515_v42 = vmul.f32 %v2286_v27, %v1310_v32 }
 0x2fa   :  { %v1386_v33 = vpop.f32.mrf.mxu0  ;;  %v1461_v57 = vpop.f32.mrf.mxu1 }
 0x2fb   :  { %v1542_v37 = vpack.c.bf16 %v1515_v42, %v1514_v29  ;;  %v1533_v34 = vmul.f32 %v2290_v30, %v1461_v57  ;;  %v1071_v0 = vpop.xlane.xlu0 %1070  ;;  %v1092_v38 = vpop.xlane.xlu1 %1091  ;;  %v1524_v2 = vmul.f32 %v2294_v46, %v1386_v33 }
 0x2fc   :  { %2297 = vrcp.f32 %v1071_v0  ;;  %v1140_v6 = vpop.xlane.xlu2 %1139 }
 0x2fd   :  { %v1692_v39 = vpack.c.bf16 %v1533_v34, %v1532_v36  ;;  %2049 = vmatmul.msk.bf16.vlgmr.msrb.gmra.mxu2 %vm456_vm1, %v1542_v37  ;;  %2299 = vrcp.f32 %v2923_v10 }
 0x2fe   :  { %2301 = vrcp.f32 %v1089_v58 }
 0x2ff   :  { %2062 = vmatmul.msk.bf16.gmra.mxu1 %vm456_vm1, %v1692_v39 }
 0x302   :  { %v2298_v35 = vpop.eup %2297  ;;  %v1388_v5 = vpop.f32.mrf.mxu0 }
 0x303   :  { %v1511_v18 = vmul.f32 %v2298_v35, %v1247_v21  ;;  %v1525_v26 = vmul.f32 %v2296_v59, %v1388_v5  ;;  %v1119_v52 = vpop.xlane.xlu1 %1118  ;;  %v1116_v22 = vpop.xlane.xlu0 %1115 }
 0x304   :  { %v1077_v16 = vpop.xlane.xlu2 %1076  ;;  %v2300_v51 = vpop.eup %2299 }
 0x305   :  { %v1636_v14 = vpack.c.bf16 %v1525_v26, %v1524_v2  ;;  %v1540_v63 = vpack.c.bf16 %v1511_v18, %v1510_v31  ;;  %2303 = vrcp.f32 %v1077_v16  ;;  %v2302_v62 = vpop.eup %2301 }
 0x307   :  { %2055 = vmatmul.msk.bf16.gmra.mxu3 %vm456_vm1, %v1540_v63  ;;  %2058 = vmatmul.msk.bf16.gmra.mxu0 %vm456_vm1, %v1636_v14 }
 0x308   :  { %v1313_v56 = vpop.f32.mrf.mxu3 }
 0x309   :  { %v1250_v20 = vpop.f32.mrf.mxu2  ;;  %v1516_v55 = vmul.f32 %v2300_v51, %v1313_v56 }
 0x30b   :  { %v1074_v13 = vpop.xlane.xlu1 %1073  ;;  %v2304_v3 = vpop.eup %2303 }
 0x30c   :  { %2305 = vrcp.f32 %v1074_v13  ;;  %v1122_v60 = vpop.xlane.xlu2 %1121 }
 0x30d   :  { %2307 = vrcp.f32 %v1116_v22 }
 0x30e   :  { %2309 = vrcp.f32 %v1119_v52 }
 0x30f   :  { %2311 = vrcp.f32 %v2927_v24 }
 0x310   :  { %v1315_v1 = vpop.f32.mrf.mxu3  ;;  %2313 = vrcp.f32 %v1092_v38 }
 0x311   :  { %v1252_v4 = vpop.f32.mrf.mxu2  ;;  %v1517_v9 = vmul.f32 %v2302_v62, %v1315_v1  ;;  %2315 = vrcp.f32 %v1140_v6 }
 0x312   :  { %v2306_v41 = vpop.eup %2305  ;;  %v1391_v8 = vpop.f32.mrf.mxu0  ;;  %v1513_v11 = vmul.f32 %v2304_v3, %v1252_v4  ;;  %2317 = vrcp.f32 %v1122_v60  ;;  %v2946_v3 = vld [vmem:[%s3140_s6] sm:$0xf] }
 0x313   :  { %v1512_v7 = vmul.f32 %v2306_v41, %v1250_v20  ;;  %v1543_v49 = vpack.c.bf16 %v1517_v9, %v1516_v55  ;;  %v1143_v10 = vpop.xlane.xlu0 %1142  ;;  %v2308_v54 = vpop.eup %2307  ;;  %v2949_v55 = vperm.slane %v2946_v3, 1 }
 0x314   :  { %v2310_v44 = vpop.eup %2309  ;;  %v1526_v40 = vmul.f32 %v2308_v54, %v1391_v8  ;;  %v1101_v32 = vpop.xlane.xlu1 %1100 }
 0x315   :  { %v1541_v12 = vpack.c.bf16 %v1513_v11, %v1512_v7  ;;  %2050 = vmatmul.msk.bf16.gmra.mxu2 %vm456_vm1, %v1543_v49  ;;  %v2312_v43 = vpop.eup %2311  ;;  %v1149_v21 = vpop.xlane.xlu2 %1148  ;;  %v2350_v11 = vld [vmem:[%s3137_s0] sm:$0xff] }
 0x316   :  { %v2314_v50 = vpop.eup %2313 }
 0x317   :  { %2056 = vmatmul.msk.bf16.gmra.mxu3 %vm456_vm1, %v1541_v12  ;;  %v2316_v45 = vpop.eup %2315 }
 0x318   :  { %v1318_v53 = vpop.f32.mrf.mxu3  ;;  %v2318_v42 = vpop.eup %2317 }
 0x319   :  { %v1518_v23 = vmul.f32 %v2314_v50, %v1318_v53 }
 0x31a   :  { %v1393_v28 = vpop.f32.mrf.mxu0 }
 0x31b   :  { %v1527_v17 = vmul.f32 %v2310_v44, %v1393_v28  ;;  %v1098_v19 = vpop.xlane.xlu0 %1097 }
 0x31c   :  { %v1146_v31 = vpop.xlane.xlu1 %1145 }
 0x31d   :  { %v1637_v48 = vpack.c.bf16 %v1527_v17, %v1526_v40  ;;  %v2351_v17 = vld [vmem:[%s3137_s0 + $0x8] sm:$0xff] }
 0x31f   :  { %2059 = vmatmul.msk.bf16.gmra.mxu0 %vm456_vm1, %v1637_v48 }
 0x320   :  { %v1320_v15 = vpop.f32.mrf.mxu3 }
 0x321   :  { %v1519_v58 = vmul.f32 %v2312_v43, %v1320_v15 }
 0x322   :  { %v1396_v61 = vpop.f32.mrf.mxu0 }
 0x323   :  { %v1544_v25 = vpack.c.bf16 %v1519_v58, %v1518_v23  ;;  %v1464_v24 = vpop.f32.mrf.mxu1  ;;  %v1125_v27 = vpop.xlane.xlu0 %1124  ;;  %v1528_v36 = vmul.f32 %v2318_v42, %v1396_v61 }
 0x324   :  { %2319 = vrcp.f32 %v1125_v27  ;;  %v1534_v0 = vmul.f32 %v2316_v45, %v1464_v24  ;;  %v2352_v45 = vld [vmem:[%s3137_s0 + $0x10] sm:$0xff] }
 0x325   :  { %2321 = vrcp.f32 %v1143_v10  ;;  %2051 = vmatmul.msk.bf16.gmra.mxu2 %vm456_vm1, %v1544_v25 }
 0x326   :  { %2323 = vrcp.f32 %v1101_v32 }
 0x327   :  { %2325 = vrcp.f32 %v1098_v19 }
 0x328   :  { %v1323_v29 = vpop.f32.mrf.mxu3  ;;  %2327 = vrcp.f32 %v1149_v21 }
 0x329   :  { %2329 = vrcp.f32 %v1146_v31 }
 0x32a   :  { %v2320_v30 = vpop.eup %2319  ;;  %v1398_v33 = vpop.f32.mrf.mxu0 }
 0x32b   :  { %v2322_v57 = vpop.eup %2321  ;;  %v1529_v37 = vmul.f32 %v2320_v30, %v1398_v33  ;;  %v1466_v34 = vpop.f32.mrf.mxu1 }
 0x32c   :  { %v1535_v38 = vmul.f32 %v2322_v57, %v1466_v34  ;;  %v2324_v47 = vpop.eup %2323 }
 0x32d   :  { %v1638_v39 = vpack.c.bf16 %v1529_v37, %v1528_v36  ;;  %v2326_v46 = vpop.eup %2325 }
 0x32e   :  { %v1693_v6 = vpack.c.bf16 %v1535_v38, %v1534_v0  ;;  %v1520_v35 = vmul.f32 %v2326_v46, %v1323_v29  ;;  %v2328_v26 = vpop.eup %2327 }
 0x32f   :  { %2060 = vmatmul.msk.bf16.gmra.mxu0 %vm456_vm1, %v1638_v39  ;;  %v2330_v52 = vpop.eup %2329  ;;  %v2353_v39 = vld [vmem:[%s3137_s0 + $0x18] sm:$0xff] }
 0x330   :  { %2063 = vmatmul.msk.bf16.gmra.mxu1 %vm456_vm1, %v1693_v6  ;;  %v1325_v59 = vpop.f32.mrf.mxu3 }
 0x331   :  { %v1521_v5 = vmul.f32 %v2324_v47, %v1325_v59 }
 0x333   :  { %v1545_v2 = vpack.c.bf16 %v1521_v5, %v1520_v35  ;;  %v1469_v18 = vpop.f32.mrf.mxu1 }
 0x334   :  { %v1536_v63 = vmul.f32 %v2330_v52, %v1469_v18 }
 0x335   :  { %2052 = vmatmul.msk.bf16.gmra.mxu2 %vm456_vm1, %v1545_v2 }
 0x338   :  { %v1615_v20 = vpop.f32.mrf.mxu3 }
 0x33b   :  { %v1471_v14 = vpop.f32.mrf.mxu1 }
 0x33c   :  { %v1537_v16 = vmul.f32 %v2328_v26, %v1471_v14  ;;  %v2354_v26 = vld [vmem:[%s3137_s0 + $0x20] sm:$0xff] }
 0x33e   :  { %v1694_v56 = vpack.c.bf16 %v1537_v16, %v1536_v63 }
 0x340   :  { %2064 = vmatmul.msk.bf16.gmra.mxu1 %vm456_vm1, %v1694_v56  ;;  %v1617_v9 = vpop.f32.mrf.mxu3 }
 0x348   :  { %v1620_v40 = vpop.f32.mrf.mxu3 }
 0x350   :  { %v1622_v15 = vpop.f32.mrf.mxu3 }
 0x365   :  { %v1663_v22 = vpop.f32.mrf.mxu0 }
 0x36c   :  { %v1719_v62 = vpop.f32.mrf.mxu1 }
 0x36d   :  { %v1665_v10 = vpop.f32.mrf.mxu0 }
 0x374   :  { %v1721_v54 = vpop.f32.mrf.mxu1 }
 0x37c   :  { %v1724_v23 = vpop.f32.mrf.mxu1 }
 0x380   :  { %v1571_v13 = vpop.f32.mrf.mxu2 }
 0x381   :  { %v1616_v51 = vadd.f32 %v1615_v20, %v1571_v13 }
 0x383   :  { %v1683_v1 = vadd.f32 %v1663_v22, %v1616_v51 }
 0x384   :  { %v1668_v48 = vpop.f32.mrf.mxu0  ;;  %v1726_v57 = vpop.f32.mrf.mxu1 }
 0x385   :  { %v1739_v4 = vadd.f32 %v1719_v62, %v1683_v1  ;;  %v2355_v1 = vld [vmem:[%s3137_s0 + $0x28] sm:$0xff] }
 0x387   :  { %v1748_v41 = vadd.f32 %v2949_v55, %v1739_v4 }
 0x388   :  { %v1573_v8 = vpop.f32.mrf.mxu2 }
 0x389   :  { %v1618_v7 = vadd.f32 %v1617_v9, %v1573_v8  ;;  %v2955_v49 = vadd.f32 %v2350_v11, %v1748_v41 }
 0x38a   :  { %v1625_v42 = vpop.f32.mrf.mxu3 }
 0x38b   :  { %v1684_v12 = vadd.f32 %v1665_v10, %v1618_v7  ;;  %v1764_v53 = vsel %vm74_vm0, %v2955_v49, 0.0 }
 0x38c   :  { %1765 = vadd.xlane.f32.xlu0 %v1764_v53  ;;  %v1670_v61 = vpop.f32.mrf.mxu0 }
 0x38d   :  { %v1740_v44 = vadd.f32 %v1721_v54, %v1684_v12 }
 0x38f   :  { %v1749_v28 = vadd.f32 %v2949_v55, %v1740_v44  ;;  %v2356_v44 = vld [vmem:[%s3137_s0 + $0x30] sm:$0xff] }
 0x391   :  { %v2963_v19 = vadd.f32 %v2351_v17, %v1749_v28 }
 0x392   :  { %v1627_v59 = vpop.f32.mrf.mxu3 }
 0x393   :  { %v1767_v43 = vsel %vm74_vm0, %v2963_v19, 0.0 }
 0x394   :  { %1768 = vadd.xlane.f32.xlu1 %v1767_v43 }
 0x398   :  { %v1576_v50 = vpop.f32.mrf.mxu2 }
 0x399   :  { %v1621_v60 = vadd.f32 %v1620_v40, %v1576_v50 }
 0x39a   :  { %v1630_v56 = vpop.f32.mrf.mxu3 }
 0x39b   :  { %v1685_v58 = vadd.f32 %v1668_v48, %v1621_v60  ;;  %v2357_v60 = vld [vmem:[%s3137_s0 + $0x38] sm:$0xff] }
 0x39c   :  { %v1673_v36 = vpop.f32.mrf.mxu0 }
 0x39d   :  { %v1741_v25 = vadd.f32 %v1724_v23, %v1685_v58  ;;  %v2362_v58 = vmov 32.0  }
 0x39e   :  { %2331 = vrcp.f32 %v2362_v58 }
 0x39f   :  { %v1750_v24 = vadd.f32 %v2949_v55, %v1741_v25 }
 0x3a0   :  { %v1578_v27 = vpop.f32.mrf.mxu2 }
 0x3a1   :  { %v1623_v32 = vadd.f32 %v1622_v15, %v1578_v27  ;;  %v2971_v29 = vadd.f32 %v2352_v45, %v1750_v24 }
 0x3a2   :  { %v1632_v11 = vpop.f32.mrf.mxu3 }
 0x3a3   :  { %v1686_v30 = vadd.f32 %v1670_v61, %v1623_v32  ;;  %v1770_v33 = vsel %vm74_vm0, %v2971_v29, 0.0 }
 0x3a4   :  { %1771 = vadd.xlane.f32.xlu2 %v1770_v33  ;;  %v1675_v35 = vpop.f32.mrf.mxu0  ;;  %v2332_v61 = vpop.eup %2331 }
 0x3a5   :  { %v1742_v37 = vadd.f32 %v1726_v57, %v1686_v30  ;;  %v1789_v25 = vmul.f32 32.0, %v2332_v61  ;;  %vm1793_vm4 = vweird.f32 %v2332_v61 }
 0x3a7   :  { %v1751_v34 = vadd.f32 %v2949_v55, %v1742_v37  ;;  %v1790_v24 = vsub.f32 1.0, %v1789_v25 }
 0x3a8   :  { %v1581_v0 = vpop.f32.mrf.mxu2 }
 0x3a9   :  { %v1626_v38 = vadd.f32 %v1625_v42, %v1581_v0  ;;  %v2979_v6 = vadd.f32 %v2353_v39, %v1751_v34  ;;  %v1791_v27 = vmul.f32 %v2332_v61, %v1790_v24 }
 0x3ab   :  { %v1773_v47 = vsel %vm74_vm0, %v2979_v6, 0.0  ;;  %v1687_v46 = vadd.f32 %v1673_v36, %v1626_v38  ;;  %v1792_v32 = vadd.f32 %v2332_v61, %v1791_v27 }
 0x3ac   :  { %1774 = vadd.xlane.f32.xlu0 %v1773_v47  ;;  %v1678_v22 = vpop.f32.mrf.mxu0 }
 0x3ad   :  { %v1729_v21 = vpop.f32.mrf.mxu1  ;;  %v3009_v45 = vsel %vm1793_vm4, %v2332_v61, %v1792_v32  ;;  %v3071_v61 = vperm.slane %v2946_v3, 3 }
 0x3ae   :  { %v1743_v5 = vadd.f32 %v1729_v21, %v1687_v46 }
 0x3b0   :  { %v1752_v31 = vadd.f32 %v2949_v55, %v1743_v5  ;;  %v1583_v2 = vpop.f32.mrf.mxu2 }
 0x3b1   :  { %v1628_v18 = vadd.f32 %v1627_v59, %v1583_v2 }
 0x3b2   :  { %v2987_v52 = vadd.f32 %v2354_v26, %v1752_v31 }
 0x3b3   :  { %v1688_v14 = vadd.f32 %v1675_v35, %v1628_v18 }
 0x3b4   :  { %v1776_v63 = vsel %vm74_vm0, %v2987_v52, 0.0  ;;  %v1680_v54 = vpop.f32.mrf.mxu0 }
 0x3b5   :  { %v1731_v16 = vpop.f32.mrf.mxu1  ;;  %1777 = vadd.xlane.f32.xlu1 %v1776_v63 }
 0x3b6   :  { %v1744_v20 = vadd.f32 %v1731_v16, %v1688_v14 }
 0x3b8   :  { %v1753_v13 = vadd.f32 %v2949_v55, %v1744_v20  ;;  %v1586_v51 = vpop.f32.mrf.mxu2 }
 0x3b9   :  { %v1631_v62 = vadd.f32 %v1630_v56, %v1586_v51 }
 0x3ba   :  { %v2995_v4 = vadd.f32 %v2355_v1, %v1753_v13 }
 0x3bb   :  { %v1689_v9 = vadd.f32 %v1678_v22, %v1631_v62 }
 0x3bc   :  { %v1779_v41 = vsel %vm74_vm0, %v2995_v4, 0.0 }
 0x3bd   :  { %1780 = vadd.xlane.f32.xlu2 %v1779_v41  ;;  %v1734_v8 = vpop.f32.mrf.mxu1 }
 0x3be   :  { %v1745_v7 = vadd.f32 %v1734_v8, %v1689_v9 }
 0x3c0   :  { %v1754_v10 = vadd.f32 %v2949_v55, %v1745_v7  ;;  %v1588_v12 = vpop.f32.mrf.mxu2 }
 0x3c1   :  { %v1633_v53 = vadd.f32 %v1632_v11, %v1588_v12 }
 0x3c2   :  { %v1762_v28 = vadd.f32 %v2356_v44, %v1754_v10 }
 0x3c3   :  { %v1690_v40 = vadd.f32 %v1680_v54, %v1633_v53 }
 0x3c4   :  { %v1782_v17 = vsel %vm74_vm0, %v1762_v28, 0.0 }
 0x3c5   :  { %1783 = vadd.xlane.f32.xlu0 %v1782_v17  ;;  %v1736_v48 = vpop.f32.mrf.mxu1 }
 0x3c6   :  { %v1746_v43 = vadd.f32 %v1736_v48, %v1690_v40 }
 0x3c8   :  { %v1755_v50 = vadd.f32 %v2949_v55, %v1746_v43 }
 0x3ca   :  { %v1763_v15 = vadd.f32 %v2357_v60, %v1755_v50 }
 0x3cc   :  { %v1785_v23 = vsel %vm74_vm0, %v1763_v15, 0.0 }
 0x3cd   :  { %1786 = vadd.xlane.f32.xlu1 %v1785_v23 }
 0x3ff   :  { %v1766_v42 = vpop.xlane.xlu0 %1765 }
 0x400   :  { %v1795_v55 = vmul.f32 %v3009_v45, %v1766_v42 }
 0x402   :  { %v3013_v30 = vsub.f32 %v2955_v49, %v1795_v55 }
 0x404   :  { %v1811_v33 = vmul.f32 %v3013_v30, %v3013_v30 }
 0x406   :  { %v1819_v57 = vsel %vm74_vm0, %v1811_v33, 0.0 }
 0x407   :  { %1820 = vadd.xlane.f32.xlu2 %v1819_v57  ;;  %v1769_v36 = vpop.xlane.xlu1 %1768 }
 0x408   :  { %v1796_v37 = vmul.f32 %v3009_v45, %v1769_v36 }
 0x40a   :  { %v3020_v34 = vsub.f32 %v2963_v19, %v1796_v37 }
 0x40c   :  { %v1812_v0 = vmul.f32 %v3020_v34, %v3020_v34 }
 0x40e   :  { %v1822_v38 = vsel %vm74_vm0, %v1812_v0, 0.0 }
 0x40f   :  { %1823 = vadd.xlane.f32.xlu0 %v1822_v38 }
 0x417   :  { %v1772_v49 = vpop.xlane.xlu2 %1771 }
 0x418   :  { %v1797_v39 = vmul.f32 %v3009_v45, %v1772_v49 }
 0x41a   :  { %v3027_v47 = vsub.f32 %v2971_v29, %v1797_v39 }
 0x41c   :  { %v1813_v46 = vmul.f32 %v3027_v47, %v3027_v47 }
 0x41e   :  { %v1825_v59 = vsel %vm74_vm0, %v1813_v46, 0.0 }
 0x41f   :  { %v1775_v21 = vpop.xlane.xlu0 %1774  ;;  %1826 = vadd.xlane.f32.xlu1 %v1825_v59 }
 0x420   :  { %v1798_v19 = vmul.f32 %v3009_v45, %v1775_v21 }
 0x422   :  { %v3034_v35 = vsub.f32 %v2979_v6, %v1798_v19 }
 0x424   :  { %v1814_v5 = vmul.f32 %v3034_v35, %v3034_v35 }
 0x426   :  { %v1828_v31 = vsel %vm74_vm0, %v1814_v5, 0.0 }
 0x427   :  { %1829 = vadd.xlane.f32.xlu2 %v1828_v31 }
 0x428   :  { %v1778_v29 = vpop.xlane.xlu1 %1777 }
 0x429   :  { %v1799_v2 = vmul.f32 %v3009_v45, %v1778_v29 }
 0x42b   :  { %v3041_v18 = vsub.f32 %v2987_v52, %v1799_v2 }
 0x42d   :  { %v1815_v26 = vmul.f32 %v3041_v18, %v3041_v18 }
 0x42f   :  { %v1831_v14 = vsel %vm74_vm0, %v1815_v26, 0.0 }
 0x430   :  { %v1781_v63 = vpop.xlane.xlu2 %1780  ;;  %1832 = vadd.xlane.f32.xlu0 %v1831_v14 }
 0x431   :  { %v1800_v6 = vmul.f32 %v3009_v45, %v1781_v63 }
 0x433   :  { %v3048_v16 = vsub.f32 %v2995_v4, %v1800_v6 }
 0x435   :  { %v1816_v56 = vmul.f32 %v3048_v16, %v3048_v16 }
 0x437   :  { %v1834_v20 = vsel %vm74_vm0, %v1816_v56, 0.0 }
 0x438   :  { %v1784_v22 = vpop.xlane.xlu0 %1783  ;;  %1835 = vadd.xlane.f32.xlu1 %v1834_v20 }
 0x439   :  { %v1801_v52 = vmul.f32 %v3009_v45, %v1784_v22 }
 0x43b   :  { %v3054_v13 = vsub.f32 %v1762_v28, %v1801_v52 }
 0x43d   :  { %v1817_v51 = vmul.f32 %v3054_v13, %v3054_v13 }
 0x43f   :  { %v1837_v62 = vsel %vm74_vm0, %v1817_v51, 0.0 }
 0x440   :  { %1838 = vadd.xlane.f32.xlu2 %v1837_v62  ;;  %v1787_v1 = vpop.xlane.xlu1 %1786 }
 0x441   :  { %v1802_v4 = vmul.f32 %v3009_v45, %v1787_v1 }
 0x443   :  { %v3060_v9 = vsub.f32 %v1763_v15, %v1802_v4  ;;  %v3068_v15 = vperm.slane %v2946_v3, 2 }
 0x445   :  { %v1818_v41 = vmul.f32 %v3060_v9, %v3060_v9 }
 0x447   :  { %v1840_v8 = vsel %vm74_vm0, %v1818_v41, 0.0 }
 0x448   :  { %1841 = vadd.xlane.f32.xlu0 %v1840_v8 }
 0x47a   :  { %v1821_v7 = vpop.xlane.xlu2 %1820 }
 0x47b   :  { %v1843_v11 = vmul.f32 %v1821_v7, %v3009_v45 }
 0x47d   :  { %v1851_v10 = vadd.f32 1e-05, %v1843_v11 }
 0x47f   :  { %2333 = vrsqrt.f32 %v1851_v10  ;;  %vm1865_vm6 = vweird.f32 %v1851_v10 }
 0x482   :  { %v1824_v12 = vpop.xlane.xlu0 %1823 }
 0x483   :  { %v1844_v53 = vmul.f32 %v1824_v12, %v3009_v45 }
 0x485   :  { %v2334_v54 = vpop.eup %2333  ;;  %v1852_v44 = vadd.f32 1e-05, %v1844_v53 }
 0x486   :  { %v1860_v28 = vmul.f32 %v2334_v54, %v1851_v10  ;;  %vm1866_vm5 = vweird.f32 %v2334_v54 }
 0x487   :  { %2335 = vrsqrt.f32 %v1852_v44  ;;  %vm1867_vm7 = vmor %vm1865_vm6, %vm1866_vm5  ;;  %vm1875_vm9 = vweird.f32 %v1852_v44 }
 0x488   :  { %v1861_v40 = vmul.f32 %v2334_v54, %v1860_v28 }
 0x48a   :  { %v1862_v17 = vmul.f32 0.5, %v1861_v40 }
 0x48c   :  { %v1863_v48 = vsub.f32 1.5, %v1862_v17 }
 0x48d   :  { %v2336_v43 = vpop.eup %2335 }
 0x48e   :  { %v1864_v50 = vmul.f32 %v2334_v54, %v1863_v48  ;;  %v1870_v60 = vmul.f32 %v2336_v43, %v1852_v44  ;;  %vm1876_vm8 = vweird.f32 %v2336_v43 }
 0x48f   :  { %vm1877_vm10 = vmor %vm1875_vm9, %vm1876_vm8 }
 0x490   :  { %v1868_v23 = vsel %vm1867_vm7, %v2334_v54, %v1864_v50  ;;  %v1871_v58 = vmul.f32 %v2336_v43, %v1870_v60 }
 0x491   :  { %v1939_v25 = vmul.f32 %v1868_v23, %v3013_v30 }
 0x492   :  { %v1872_v24 = vmul.f32 0.5, %v1871_v58  ;;  %v1827_v27 = vpop.xlane.xlu1 %1826 }
 0x493   :  { %v1948_v32 = vmul.f32 %v3068_v15, %v1939_v25  ;;  %v1845_v42 = vmul.f32 %v1827_v27, %v3009_v45 }
 0x494   :  { %v1873_v55 = vsub.f32 1.5, %v1872_v24 }
 0x495   :  { %v1957_v33 = vadd.f32 %v3071_v61, %v1948_v32  ;;  %v1853_v57 = vadd.f32 1e-05, %v1845_v42 }
 0x496   :  { %v1874_v36 = vmul.f32 %v2336_v43, %v1873_v55 }
 0x497   :  { %1965 = vst.msk [vmem:[%s3142_s7] sm:$0xff] %vm74_vm0, %v1957_v33  ;;  %2337 = vrsqrt.f32 %v1853_v57  ;;  %vm1885_vm12 = vweird.f32 %v1853_v57 }
 0x498   :  { %v1878_v3 = vsel %vm1877_vm10, %v2336_v43, %v1874_v36 }
 0x499   :  { %v1940_v30 = vmul.f32 %v1878_v3, %v3020_v34 }
 0x49a   :  { %v1830_v37 = vpop.xlane.xlu2 %1829 }
 0x49b   :  { %v1949_v0 = vmul.f32 %v3068_v15, %v1940_v30  ;;  %v1846_v38 = vmul.f32 %v1830_v37, %v3009_v45 }
 0x49d   :  { %v2338_v49 = vpop.eup %2337  ;;  %v1958_v39 = vadd.f32 %v3071_v61, %v1949_v0  ;;  %v1854_v46 = vadd.f32 1e-05, %v1846_v38 }
 0x49e   :  { %v1880_v59 = vmul.f32 %v2338_v49, %v1853_v57  ;;  %vm1886_vm11 = vweird.f32 %v2338_v49 }
 0x49f   :  { %1966 = vst.msk [vmem:[%s3142_s7 + $0x8] sm:$0xff] %vm74_vm0, %v1958_v39  ;;  %2339 = vrsqrt.f32 %v1854_v46  ;;  %vm1887_vm13 = vmor %vm1885_vm12, %vm1886_vm11  ;;  %vm1895_vm15 = vweird.f32 %v1854_v46 }
 0x4a0   :  { %v1881_v21 = vmul.f32 %v2338_v49, %v1880_v59 }
 0x4a2   :  { %v1882_v19 = vmul.f32 0.5, %v1881_v21 }
 0x4a3   :  { %v1833_v5 = vpop.xlane.xlu0 %1832 }
 0x4a4   :  { %v1883_v34 = vsub.f32 1.5, %v1882_v19  ;;  %v1847_v31 = vmul.f32 %v1833_v5, %v3009_v45 }
 0x4a5   :  { %v2340_v29 = vpop.eup %2339 }
 0x4a6   :  { %v1884_v2 = vmul.f32 %v2338_v49, %v1883_v34  ;;  %v1890_v26 = vmul.f32 %v2340_v29, %v1854_v46  ;;  %v1855_v14 = vadd.f32 1e-05, %v1847_v31  ;;  %vm1896_vm14 = vweird.f32 %v2340_v29 }
 0x4a7   :  { %vm1897_vm1 = vmor %vm1895_vm15, %vm1896_vm14 }
 0x4a8   :  { %v1888_v63 = vsel %vm1887_vm13, %v2338_v49, %v1884_v2  ;;  %v1891_v6 = vmul.f32 %v2340_v29, %v1890_v26  ;;  %2341 = vrsqrt.f32 %v1855_v14  ;;  %vm1905_vm3 = vweird.f32 %v1855_v14 }
 0x4a9   :  { %v1941_v56 = vmul.f32 %v1888_v63, %v3027_v47 }
 0x4aa   :  { %v1892_v20 = vmul.f32 0.5, %v1891_v6 }
 0x4ab   :  { %v1950_v22 = vmul.f32 %v3068_v15, %v1941_v56  ;;  %v1836_v52 = vpop.xlane.xlu1 %1835 }
 0x4ac   :  { %v1893_v51 = vsub.f32 1.5, %v1892_v20  ;;  %v1848_v62 = vmul.f32 %v1836_v52, %v3009_v45 }
 0x4ad   :  { %v1959_v1 = vadd.f32 %v3071_v61, %v1950_v22 }
 0x4ae   :  { %v2342_v4 = vpop.eup %2341  ;;  %v1894_v41 = vmul.f32 %v2340_v29, %v1893_v51  ;;  %v1856_v8 = vadd.f32 1e-05, %v1848_v62 }
 0x4af   :  { %1967 = vst.msk [vmem:[%s3142_s7 + $0x10] sm:$0xff] %vm74_vm0, %v1959_v1  ;;  %v1900_v47 = vmul.f32 %v2342_v4, %v1855_v14  ;;  %vm1906_vm2 = vweird.f32 %v2342_v4 }
 0x4b0   :  { %v1898_v7 = vsel %vm1897_vm1, %v2340_v29, %v1894_v41  ;;  %2343 = vrsqrt.f32 %v1856_v8  ;;  %vm1907_vm4 = vmor %vm1905_vm3, %vm1906_vm2  ;;  %vm1915_vm6 = vweird.f32 %v1856_v8 }
 0x4b1   :  { %v1942_v11 = vmul.f32 %v1898_v7, %v3034_v35  ;;  %v1901_v10 = vmul.f32 %v2342_v4, %v1900_v47 }
 0x4b3   :  { %v1951_v12 = vmul.f32 %v3068_v15, %v1942_v11  ;;  %v1902_v53 = vmul.f32 0.5, %v1901_v10  ;;  %v1839_v54 = vpop.xlane.xlu2 %1838 }
 0x4b4   :  { %v1849_v44 = vmul.f32 %v1839_v54, %v3009_v45 }
 0x4b5   :  { %v1960_v28 = vadd.f32 %v3071_v61, %v1951_v12  ;;  %v1903_v40 = vsub.f32 1.5, %v1902_v53 }
 0x4b6   :  { %v2344_v17 = vpop.eup %2343  ;;  %v1857_v48 = vadd.f32 1e-05, %v1849_v44 }
 0x4b7   :  { %1968 = vst.msk [vmem:[%s3142_s7 + $0x18] sm:$0xff] %vm74_vm0, %v1960_v28  ;;  %v1904_v43 = vmul.f32 %v2342_v4, %v1903_v40  ;;  %v1910_v35 = vmul.f32 %v2344_v17, %v1856_v8  ;;  %vm1916_vm5 = vweird.f32 %v2344_v17 }
 0x4b8   :  { %2345 = vrsqrt.f32 %v1857_v48  ;;  %vm1917_vm7 = vmor %vm1915_vm6, %vm1916_vm5  ;;  %vm1925_vm9 = vweird.f32 %v1857_v48 }
 0x4b9   :  { %v1908_v50 = vsel %vm1907_vm4, %v2342_v4, %v1904_v43  ;;  %v1911_v60 = vmul.f32 %v2344_v17, %v1910_v35 }
 0x4ba   :  { %v1943_v23 = vmul.f32 %v1908_v50, %v3041_v18 }
 0x4bb   :  { %v1912_v58 = vmul.f32 0.5, %v1911_v60  ;;  %v1842_v25 = vpop.xlane.xlu0 %1841 }
 0x4bc   :  { %v1952_v24 = vmul.f32 %v3068_v15, %v1943_v23  ;;  %v1850_v27 = vmul.f32 %v1842_v25, %v3009_v45 }
 0x4bd   :  { %v1913_v32 = vsub.f32 1.5, %v1912_v58 }
 0x4be   :  { %v2346_v42 = vpop.eup %2345  ;;  %v1961_v55 = vadd.f32 %v3071_v61, %v1952_v24  ;;  %v1858_v33 = vadd.f32 1e-05, %v1850_v27 }
 0x4bf   :  { %v1914_v57 = vmul.f32 %v2344_v17, %v1913_v32  ;;  %v1920_v36 = vmul.f32 %v2346_v42, %v1857_v48  ;;  %vm1926_vm8 = vweird.f32 %v2346_v42 }
 0x4c0   :  { %1969 = vst.msk [vmem:[%s3142_s7 + $0x20] sm:$0xff] %vm74_vm0, %v1961_v55  ;;  %2347 = vrsqrt.f32 %v1858_v33  ;;  %vm1927_vm10 = vmor %vm1925_vm9, %vm1926_vm8  ;;  %vm1935_vm12 = vweird.f32 %v1858_v33 }
 0x4c1   :  { %v1918_v18 = vsel %vm1917_vm7, %v2344_v17, %v1914_v57  ;;  %v1921_v3 = vmul.f32 %v2346_v42, %v1920_v36 }
 0x4c2   :  { %v1944_v45 = vmul.f32 %v1918_v18, %v3048_v16 }
 0x4c3   :  { %v1922_v30 = vmul.f32 0.5, %v1921_v3 }
 0x4c4   :  { %v1953_v37 = vmul.f32 %v3068_v15, %v1944_v45 }
 0x4c5   :  { %v1923_v0 = vsub.f32 1.5, %v1922_v30 }
 0x4c6   :  { %v2348_v38 = vpop.eup %2347  ;;  %v1962_v49 = vadd.f32 %v3071_v61, %v1953_v37 }
 0x4c7   :  { %v1924_v39 = vmul.f32 %v2346_v42, %v1923_v0  ;;  %v1930_v46 = vmul.f32 %v2348_v38, %v1858_v33  ;;  %vm1936_vm11 = vweird.f32 %v2348_v38 }
 0x4c8   :  { %1970 = vst.msk [vmem:[%s3142_s7 + $0x28] sm:$0xff] %vm74_vm0, %v1962_v49  ;;  %vm1937_vm13 = vmor %vm1935_vm12, %vm1936_vm11 }
 0x4c9   :  { %v1928_v59 = vsel %vm1927_vm10, %v2346_v42, %v1924_v39  ;;  %v1931_v21 = vmul.f32 %v2348_v38, %v1930_v46 }
 0x4ca   :  { %v1945_v16 = vmul.f32 %v1928_v59, %v3054_v13 }
 0x4cb   :  { %v1932_v19 = vmul.f32 0.5, %v1931_v21 }
 0x4cc   :  { %v1954_v5 = vmul.f32 %v3068_v15, %v1945_v16 }
 0x4cd   :  { %v1933_v34 = vsub.f32 1.5, %v1932_v19 }
 0x4ce   :  { %v1963_v31 = vadd.f32 %v3071_v61, %v1954_v5 }
 0x4cf   :  { %v1934_v29 = vmul.f32 %v2348_v38, %v1933_v34 }
 0x4d0   :  { %1971 = vst.msk [vmem:[%s3142_s7 + $0x30] sm:$0xff] %vm74_vm0, %v1963_v31 }
 0x4d1   :  { %v1938_v2 = vsel %vm1937_vm13, %v2348_v38, %v1934_v29 }
 0x4d2   :  { %v1946_v26 = vmul.f32 %v1938_v2, %v3060_v9 }
 0x4d4   :  { %v1955_v13 = vmul.f32 %v3068_v15, %v1946_v26 }
 0x4d6   :  { %v1964_v14 = vadd.f32 %v3071_v61, %v1955_v13 }
 0x4d8   :  { %1972 = vst.msk [vmem:[%s3142_s7 + $0x38] sm:$0xff] %vm74_vm0, %v1964_v14 }

</bundles_post_ra>
